<compile_context>
chip_gen: v7x
topology: tpu7x:2x2x1
jax: 0.10.0
libtpu: 0.0.40
codegen_flags: <defaults>
</compile_context>

<pallas_src>
import jax
import jax.numpy as jnp
from jax.experimental import pallas as pl
from jax.experimental.pallas import tpu as pltpu

# Original (PyTorch) model dimensions.
input_size = 784
hidden1_size = 500
hidden2_size = 300
num_classes = 10

# Padded *output* feature dims (multiples of 128) for clean MXU N tiles and a
# lane-dense final store.  The input feature dim (784) stays unpadded.
H1_PAD = 512    # 500 -> 4 * 128
H2_PAD = 384    # 300 -> 3 * 128
OUT_PAD = 128   # 10  -> 1 * 128

DEFAULT_BATCH_TILE = 512   # v6e/v7x sweet spot; v5e is compute-bound, also fine.


def _mlp_kernel(x_ref, w1_ref, b1_ref, w2_ref, b2_ref, w3_ref, b3_ref, o_ref):
    """One batch tile of relu(relu(x@W1+b1)@W2+b2)@W3+b3 (weights VMEM-resident)."""
    # x streams in as f32 straight from HBM; cast to bf16 just before the MXU.
    x = x_ref[...].astype(jnp.bfloat16)                                  # (TB, 784)
    h1 = jnp.dot(x, w1_ref[...], preferred_element_type=jnp.float32) + b1_ref[...]
    h1 = jnp.maximum(h1, 0.0).astype(jnp.bfloat16)
    h2 = jnp.dot(h1, w2_ref[...], preferred_element_type=jnp.float32) + b2_ref[...]
    h2 = jnp.maximum(h2, 0.0).astype(jnp.bfloat16)
    out = jnp.dot(h2, w3_ref[...], preferred_element_type=jnp.float32) + b3_ref[...]
    o_ref[...] = out.astype(o_ref.dtype)                                 # bf16 (TB, 128)


def _pad2d(a, rows, cols):
    return jnp.pad(a, ((0, rows - a.shape[0]), (0, cols - a.shape[1])))


def prepare_params(w1, b1, w2, b2, w3, b3):
    """Zero-pad output dims to 128 multiples; weights -> bf16, biases stay f32.

    Done ONCE at init; padded entries are zero so they contribute exactly 0.
    W1's input dim (784) is left unpadded to match the unpadded activation stream.
    """
    w1p = _pad2d(w1, input_size, H1_PAD).astype(jnp.bfloat16)   # (784, 512)
    w2p = _pad2d(w2, H1_PAD, H2_PAD).astype(jnp.bfloat16)       # (512, 384)
    w3p = _pad2d(w3, H2_PAD, OUT_PAD).astype(jnp.bfloat16)      # (384, 128)
    b1p = _pad2d(b1, 1, H1_PAD).astype(jnp.float32)
    b2p = _pad2d(b2, 1, H2_PAD).astype(jnp.float32)
    b3p = _pad2d(b3, 1, OUT_PAD).astype(jnp.float32)
    return w1p, b1p, w2p, b2p, w3p, b3p


def _round_up(n, m):
    return ((n + m - 1) // m) * m


def _choose_batch_tile(B, batch_tile):
    """Never pad the batch beyond the 8-sublane minimum; keep >=2 tiles on mid-size B."""
    tile = min(batch_tile, _round_up(B, 8))
    # v7x occupancy: if the whole batch fits in one tile but is big enough to
    # split, halve it so dimension_semantics=("parallel",) gives both TCs work.
    if B > 256 and pl.cdiv(B, tile) < 2:
        tile = max(128, _round_up(pl.cdiv(B, 2), 128))
    return tile


def logistic_regression_forward(x, w1p, b1p, w2p, b2p, w3p, b3p,
                                *, batch_tile=DEFAULT_BATCH_TILE):
    """x: (B, input_size) f32.  Params: padded/bf16 output of `prepare_params`.

    Returns (B, num_classes) f32 logits (same semantics as the PyTorch module,
    with bf16 matmul inputs / f32 accumulation).
    """
    B = x.shape[0]
    tile = _choose_batch_tile(B, batch_tile)
    n_tiles = pl.cdiv(B, tile)   # partial last block OK: rows are independent,
                                 # out-of-range output rows are discarded.

    # Weight/bias blocks: constant index_map -> stay resident across batch tiles.
    resident = lambda shape: pl.BlockSpec(shape, lambda i: (0, 0))

    flops = 2 * B * (input_size * H1_PAD + H1_PAD * H2_PAD + H2_PAD * OUT_PAD)
    bytes_accessed = (
        (input_size * H1_PAD + H1_PAD * H2_PAD + H2_PAD * OUT_PAD) * 2   # bf16 weights
        + (H1_PAD + H2_PAD + OUT_PAD) * 4                                # f32 biases
        + B * input_size * 4                                             # f32 activations in (no pre-pass)
        + B * OUT_PAD * 2                                                # bf16 logits out
    )

    out_padded = pl.pallas_call(
        _mlp_kernel,
        out_shape=jax.ShapeDtypeStruct((B, OUT_PAD), jnp.bfloat16),
        grid=(n_tiles,),
        in_specs=[
            # Streamed activations: unpadded f32, last dim == full array dim (legal).
            pl.BlockSpec((tile, input_size), lambda i: (i, 0)),
            resident((input_size, H1_PAD)),
            resident((1, H1_PAD)),
            resident((H1_PAD, H2_PAD)),
            resident((1, H2_PAD)),
            resident((H2_PAD, OUT_PAD)),
            resident((1, OUT_PAD)),
        ],
        out_specs=pl.BlockSpec((tile, OUT_PAD), lambda i: (i, 0)),
        compiler_params=pltpu.CompilerParams(
            dimension_semantics=("parallel",),   # shards batch tiles over v7x's 2 TCs
            vmem_limit_bytes=32 << 20,           # headroom for TB=512 f32 x-tiles
        ),
        cost_estimate=pl.CostEstimate(
            flops=flops, transcendentals=0, bytes_accessed=bytes_accessed),
    )(x, w1p, b1p, w2p, b2p, w3p, b3p)

    # Slice off padded logit columns; give back f32 like the PyTorch module.
    return out_padded[:, :num_classes].astype(jnp.float32)


def init_params(key):
    """Deterministic parameter init (PyTorch-Linear-style uniform bounds).

    Weights stored transposed vs. PyTorch, i.e. (in_features, out_features).
    """
    ks = jax.random.split(key, 6)

    def linear(kw, kb, fan_in, fan_out):
        bound = 1.0 / jnp.sqrt(fan_in)
        w = jax.random.uniform(kw, (fan_in, fan_out), jnp.float32, -bound, bound)
        b = jax.random.uniform(kb, (1, fan_out), jnp.float32, -bound, bound)
        return w, b

    w1, b1 = linear(ks[0], ks[1], input_size, hidden1_size)
    w2, b2 = linear(ks[2], ks[3], hidden1_size, hidden2_size)
    w3, b3 = linear(ks[4], ks[5], hidden2_size, num_classes)
    return w1, b1, w2, b2, w3, b3


def reference_forward_f32(x, w1, b1, w2, b2, w3, b3):
    h1 = jnp.maximum(x @ w1 + b1, 0.0)
    h2 = jnp.maximum(h1 @ w2 + b2, 0.0)
    return h2 @ w3 + b3


def reference_forward_bf16(x, w1, b1, w2, b2, w3, b3):
    """Mirrors the kernel's bf16-input / f32-accumulate / bf16-output numerics."""
    dot = lambda a, b: jnp.dot(a.astype(jnp.bfloat16), b.astype(jnp.bfloat16),
                               preferred_element_type=jnp.float32)
    h1 = jnp.maximum(dot(x, w1) + b1, 0.0)
    h2 = jnp.maximum(dot(h1, w2) + b2, 0.0)
    out = dot(h2, w3) + b3
    return out.astype(jnp.bfloat16).astype(jnp.float32)


if __name__ == "__main__":
    key = jax.random.PRNGKey(0)
    k_x, k_p = jax.random.split(key)

    batch = 8
    x = jax.random.normal(k_x, (batch, input_size), jnp.float32)
    params = init_params(k_p)
    padded_params = prepare_params(*params)   # pad + bf16-cast once

    out = logistic_regression_forward(x, *padded_params)
    out = jax.block_until_ready(out)
    assert out.shape == (batch, num_classes)

    # Tight check against a reference using identical bf16/f32 numerics.
    ref_bf16 = reference_forward_bf16(x, *params)
    assert jnp.allclose(out, ref_bf16, atol=1e-2, rtol=1e-2), (
        float(jnp.max(jnp.abs(out - ref_bf16))))

    # Sanity check against the pure-f32 PyTorch-equivalent forward.
    ref_f32 = reference_forward_f32(x, *params)
    assert jnp.allclose(out, ref_f32, atol=1e-1, rtol=1e-1), (
        float(jnp.max(jnp.abs(out - ref_f32))))

    print("KERNEL_OK")
</pallas_src>

<mosaic_0001>
module attributes {stable_mosaic.version = 11 : i64} {
  func.func @_mlp_kernel(%arg0: i32, %arg1: memref<8x784xf32, #tpu.memory_space<vmem>>, %arg2: memref<784x512xbf16, #tpu.memory_space<vmem>>, %arg3: memref<1x512xf32, #tpu.memory_space<vmem>>, %arg4: memref<512x384xbf16, #tpu.memory_space<vmem>>, %arg5: memref<1x384xf32, #tpu.memory_space<vmem>>, %arg6: memref<384x128xbf16, #tpu.memory_space<vmem>>, %arg7: memref<1x128xf32, #tpu.memory_space<vmem>>, %arg8: memref<8x128xbf16, #tpu.memory_space<vmem>>) attributes {dimension_semantics = [#tpu.dimension_semantics<parallel>], iteration_bounds = array<i64: 1>, scalar_prefetch = 0 : i64, scratch_operands = 0 : i64, tpu.core_type = #tpu.core_type<tc>, window_params = [{transform_indices = @transform_0, window_bounds = array<i64: 8, 784>}, {pipeline_mode = #tpu.pipeline_mode<synchronous>, transform_indices = @transform_1, window_bounds = array<i64: 784, 512>}, {pipeline_mode = #tpu.pipeline_mode<synchronous>, transform_indices = @transform_2, window_bounds = array<i64: 1, 512>}, {pipeline_mode = #tpu.pipeline_mode<synchronous>, transform_indices = @transform_3, window_bounds = array<i64: 512, 384>}, {pipeline_mode = #tpu.pipeline_mode<synchronous>, transform_indices = @transform_4, window_bounds = array<i64: 1, 384>}, {pipeline_mode = #tpu.pipeline_mode<synchronous>, transform_indices = @transform_5, window_bounds = array<i64: 384, 128>}, {pipeline_mode = #tpu.pipeline_mode<synchronous>, transform_indices = @transform_6, window_bounds = array<i64: 1, 128>}, {transform_indices = @transform_7, window_bounds = array<i64: 8, 128>}]} {
    %c0 = arith.constant 0 : index
    %c0_0 = arith.constant 0 : index
    %0 = vector.load %arg1[%c0, %c0_0] : memref<8x784xf32, #tpu.memory_space<vmem>>, vector<8x784xf32>
    %1 = arith.truncf %0 : vector<8x784xf32> to vector<8x784xbf16>
    %c0_1 = arith.constant 0 : index
    %c0_2 = arith.constant 0 : index
    %2 = vector.load %arg2[%c0_1, %c0_2] : memref<784x512xbf16, #tpu.memory_space<vmem>>, vector<784x512xbf16>
    %cst = arith.constant dense<0.000000e+00> : vector<8x512xf32>
    %3 = tpu.matmul %1, %2, %cst {dimension_numbers = #tpu.dot_dimension_numbers<[1], [0], [0], [1], [0, 0, 1, 1], [], []>} : vector<8x784xbf16>, vector<784x512xbf16>, vector<8x512xf32> -> vector<8x512xf32>
    %c0_3 = arith.constant 0 : index
    %c0_4 = arith.constant 0 : index
    %4 = vector.load %arg3[%c0_3, %c0_4] : memref<1x512xf32, #tpu.memory_space<vmem>>, vector<1x512xf32>
    %5 = vector.broadcast %4 : vector<1x512xf32> to vector<8x512xf32>
    %6 = arith.addf %3, %5 : vector<8x512xf32>
    %cst_5 = arith.constant 0.000000e+00 : f32
    %7 = vector.broadcast %cst_5 : f32 to vector<8x512xf32>
    %8 = arith.maximumf %6, %7 : vector<8x512xf32>
    %9 = arith.truncf %8 : vector<8x512xf32> to vector<8x512xbf16>
    %c0_6 = arith.constant 0 : index
    %c0_7 = arith.constant 0 : index
    %10 = vector.load %arg4[%c0_6, %c0_7] : memref<512x384xbf16, #tpu.memory_space<vmem>>, vector<512x384xbf16>
    %cst_8 = arith.constant dense<0.000000e+00> : vector<8x384xf32>
    %11 = tpu.matmul %9, %10, %cst_8 {dimension_numbers = #tpu.dot_dimension_numbers<[1], [0], [0], [1], [0, 0, 1, 1], [], []>} : vector<8x512xbf16>, vector<512x384xbf16>, vector<8x384xf32> -> vector<8x384xf32>
    %c0_9 = arith.constant 0 : index
    %c0_10 = arith.constant 0 : index
    %12 = vector.load %arg5[%c0_9, %c0_10] : memref<1x384xf32, #tpu.memory_space<vmem>>, vector<1x384xf32>
    %13 = vector.broadcast %12 : vector<1x384xf32> to vector<8x384xf32>
    %14 = arith.addf %11, %13 : vector<8x384xf32>
    %cst_11 = arith.constant 0.000000e+00 : f32
    %15 = vector.broadcast %cst_11 : f32 to vector<8x384xf32>
    %16 = arith.maximumf %14, %15 : vector<8x384xf32>
    %17 = arith.truncf %16 : vector<8x384xf32> to vector<8x384xbf16>
    %c0_12 = arith.constant 0 : index
    %c0_13 = arith.constant 0 : index
    %18 = vector.load %arg6[%c0_12, %c0_13] : memref<384x128xbf16, #tpu.memory_space<vmem>>, vector<384x128xbf16>
    %cst_14 = arith.constant dense<0.000000e+00> : vector<8x128xf32>
    %19 = tpu.matmul %17, %18, %cst_14 {dimension_numbers = #tpu.dot_dimension_numbers<[1], [0], [0], [1], [0, 0, 1, 1], [], []>} : vector<8x384xbf16>, vector<384x128xbf16>, vector<8x128xf32> -> vector<8x128xf32>
    %c0_15 = arith.constant 0 : index
    %c0_16 = arith.constant 0 : index
    %20 = vector.load %arg7[%c0_15, %c0_16] : memref<1x128xf32, #tpu.memory_space<vmem>>, vector<1x128xf32>
    %21 = vector.broadcast %20 : vector<1x128xf32> to vector<8x128xf32>
    %22 = arith.addf %19, %21 : vector<8x128xf32>
    %23 = arith.truncf %22 : vector<8x128xf32> to vector<8x128xbf16>
    %c0_17 = arith.constant 0 : index
    %c0_18 = arith.constant 0 : index
    %24 = vector.load %arg8[%c0_17, %c0_18] : memref<8x128xbf16, #tpu.memory_space<vmem>>, vector<8x128xbf16>
    tpu.vector_store %arg8[%c0_17, %c0_18], %23 {strides = array<i32>} : memref<8x128xbf16, #tpu.memory_space<vmem>>, vector<8x128xbf16>,
    return
  }
  func.func @transform_0(%arg0: i32) -> (i32, i32) {
    %c0_i32 = arith.constant 0 : i32
    %c0_i32_0 = arith.constant 0 : i32
    return %arg0, %c0_i32 : i32, i32
  }
  func.func @transform_1(%arg0: i32) -> (i32, i32) {
    %c0_i32 = arith.constant 0 : i32
    %c0_i32_0 = arith.constant 0 : i32
    %c0_i32_1 = arith.constant 0 : i32
    return %c0_i32, %c0_i32_0 : i32, i32
  }
  func.func @transform_2(%arg0: i32) -> (i32, i32) {
    %c0_i32 = arith.constant 0 : i32
    %c0_i32_0 = arith.constant 0 : i32
    %c0_i32_1 = arith.constant 0 : i32
    return %c0_i32, %c0_i32_0 : i32, i32
  }
  func.func @transform_3(%arg0: i32) -> (i32, i32) {
    %c0_i32 = arith.constant 0 : i32
    %c0_i32_0 = arith.constant 0 : i32
    %c0_i32_1 = arith.constant 0 : i32
    return %c0_i32, %c0_i32_0 : i32, i32
  }
  func.func @transform_4(%arg0: i32) -> (i32, i32) {
    %c0_i32 = arith.constant 0 : i32
    %c0_i32_0 = arith.constant 0 : i32
    %c0_i32_1 = arith.constant 0 : i32
    return %c0_i32, %c0_i32_0 : i32, i32
  }
  func.func @transform_5(%arg0: i32) -> (i32, i32) {
    %c0_i32 = arith.constant 0 : i32
    %c0_i32_0 = arith.constant 0 : i32
    %c0_i32_1 = arith.constant 0 : i32
    return %c0_i32, %c0_i32_0 : i32, i32
  }
  func.func @transform_6(%arg0: i32) -> (i32, i32) {
    %c0_i32 = arith.constant 0 : i32
    %c0_i32_0 = arith.constant 0 : i32
    %c0_i32_1 = arith.constant 0 : i32
    return %c0_i32, %c0_i32_0 : i32, i32
  }
  func.func @transform_7(%arg0: i32) -> (i32, i32) {
    %c0_i32 = arith.constant 0 : i32
    %c0_i32_0 = arith.constant 0 : i32
    return %arg0, %c0_i32 : i32, i32
  }
}

</mosaic_0001>

<bundles_post_ra>
// kernel: tpu_custom_call.1
= control target key start
LH: loop header
LB: loop body
LE: loop exit
PB: predicated region body
PF: predicated region fallthrough
CT: control target
= control target key end

     0   :  { %12 = vsyncpa [#allocation3], 0  ;;  %s3932_s0 = inlined_call_operand.hbm [shape: f32[8,784], index: 0, kind: input, shape index: {}]   ;;  %s3933_s1 = inlined_call_operand.hbm [shape: bf16[784,512], index: 1, kind: input, shape index: {}]   ;;  %s3934_s2 = inlined_call_operand.vmem [shape: f32[1,512], index: 2, kind: input, shape index: {}]   ;;  %s3935_s3 = inlined_call_operand.hbm [shape: bf16[512,384], index: 3, kind: input, shape index: {}]   ;;  %s3936_s4 = inlined_call_operand.vmem [shape: f32[1,384], index: 4, kind: input, shape index: {}]   ;;  %s3937_s5 = inlined_call_operand.hbm [shape: bf16[384,128], index: 5, kind: input, shape index: {}]   ;;  %s3938_s6 = inlined_call_operand.vmem [shape: f32[1,128], index: 6, kind: input, shape index: {}]   ;;  %s3939_s7 = inlined_call_operand.hbm [shape: bf16[8,128], index: 7, kind: output, shape index: {}]  }
   0x1   :  { %13 = vsyncpa [#allocation6], 0 }
   0x2   :  { %14 = vsyncpa [#allocation9], 0 }
   0x3   :  { %15 = vsyncpa [#allocation4], 0  ;;  %s3782_s24 = smov [#allocation5]   ;;  %s3664_s28 = scalar_lea.hbm %s3933_s1, 25088 }
   0x4   :  { %s31_s25 = sshll.u32 %s3782_s24, 4  ;;  %p3665_p0 = scmp.ne.s32.totalorder %s3933_s1, %s3664_s28  ;;  %s32_s25 = int_to_ptr.vmem [resolvable:$true] %s31_s25 }
   0x5   :  { %p3668_p1 = scmp.lt.u32.totalorder %s3664_s28, %s3933_s1 }
   0x7   :  { %p3670_p2 = pnand %p3668_p1, %p3665_p0 }
   0x9   :  { %3673 = shalt.err (!%p3670_p2)
}
   0xa   :  { %s3674_s10 = scalar_lea.vmem %s32_s25, 25088  ;;  %p3679_p4 = scmp.lt.s32.totalorder %s32_s25, %s32_s25 }
   0xb   :  { %p3675_p3 = scmp.ne.s32.totalorder %s32_s25, %s3674_s10  ;;  %p3680_p5 = scmp.lt.s32.totalorder %s3674_s10, %s3674_s10 }
   0xd   :  { %p3681_p6 = por %p3680_p5, %p3679_p4 }
   0xf   :  { %p3682_p7 = pnand %p3681_p6, %p3675_p3 }
  0x11   :  { %3685 = shalt.err (!%p3682_p7)
}
  0x12   :  { %s3783_s11 = smov 256   ;;  %s3784_s12 = smov 16  }
  0x13   :  { %37 = dma.hbm_to_vmem [thread:$0]  %s3933_s1, 25088, %s32_s25, [#allocation6], %s3783_s11, %s3783_s11, %s3784_s12  }
  0x14   :  { %s3785_s15 = smov [#allocation2]   ;;  %s3786_s17 = smov [#allocation7]  }
  0x15   :  { %s22_s16 = sshll.u32 %s3785_s15, 4  ;;  %s45_s18 = sshll.u32 %s3786_s17, 4  ;;  %s23_s16 = int_to_ptr.vmem [resolvable:$true] %s22_s16  ;;  %s46_s18 = int_to_ptr.vmem [resolvable:$true] %s45_s18 }
  0x16   :  { %s3686_s21 = scalar_lea.hbm %s3932_s0, 896 }
  0x17   :  { %p3687_p8 = scmp.ne.s32.totalorder %s3932_s0, %s3686_s21  ;;  %p3690_p9 = scmp.lt.u32.totalorder %s3686_s21, %s3932_s0 }
  0x19   :  { %p3692_p10 = pnand %p3690_p9, %p3687_p8 }
  0x1b   :  { %3695 = shalt.err (!%p3692_p10)
}
  0x1c   :  { %s3696_s1 = scalar_lea.vmem %s23_s16, 896  ;;  %p3701_p12 = scmp.lt.s32.totalorder %s23_s16, %s23_s16 }
  0x1d   :  { %p3697_p11 = scmp.ne.s32.totalorder %s23_s16, %s3696_s1  ;;  %p3702_p13 = scmp.lt.s32.totalorder %s3696_s1, %s3696_s1 }
  0x1f   :  { %p3703_p0 = por %p3702_p13, %p3701_p12 }
  0x21   :  { %p3704_p1 = pnand %p3703_p0, %p3697_p11 }
  0x23   :  { %3707 = shalt.err (!%p3704_p1)
}
  0x24   :  { %25 = dma.hbm_to_vmem [thread:$0]  %s3932_s0, 896, %s23_s16, [#allocation3]  }
  0x25   :  { %s3708_s30 = scalar_lea.hbm %s3935_s3, 12288 }
  0x26   :  { %p3709_p2 = scmp.ne.s32.totalorder %s3935_s3, %s3708_s30  ;;  %p3712_p3 = scmp.lt.u32.totalorder %s3708_s30, %s3935_s3 }
  0x28   :  { %p3714_p4 = pnand %p3712_p3, %p3709_p2 }
  0x2a   :  { %3717 = shalt.err (!%p3714_p4)
}
  0x2b   :  { %s3718_s12 = scalar_lea.vmem %s46_s18, 12288  ;;  %p3723_p6 = scmp.lt.s32.totalorder %s46_s18, %s46_s18 }
  0x2c   :  { %p3719_p5 = scmp.ne.s32.totalorder %s46_s18, %s3718_s12  ;;  %p3724_p7 = scmp.lt.s32.totalorder %s3718_s12, %s3718_s12 }
  0x2e   :  { %p3725_p8 = por %p3724_p7, %p3723_p6 }
  0x30   :  { %p3726_p9 = pnand %p3725_p8, %p3719_p5 }
  0x32   :  { %3729 = shalt.err (!%p3726_p9)
}
  0x33   :  { %s3787_s0 = smov 192   ;;  %s3788_s13 = smov 12  }
  0x34   :  { %51 = dma.hbm_to_vmem [thread:$0]  %s3935_s3, 12288, %s46_s18, [#allocation6], %s3787_s0, %s3787_s0, %s3788_s13  }
  0x35   :  { %s3789_s16 = smov [#allocation8]   ;;  %s3730_s21 = scalar_lea.hbm %s3937_s5, 3072 }
  0x36   :  { %s59_s17 = sshll.u32 %s3789_s16, 4  ;;  %p3731_p10 = scmp.ne.s32.totalorder %s3937_s5, %s3730_s21  ;;  %s60_s17 = int_to_ptr.vmem [resolvable:$true] %s59_s17 }
  0x37   :  { %p3734_p11 = scmp.lt.u32.totalorder %s3730_s21, %s3937_s5 }
  0x39   :  { %p3736_p12 = pnand %p3734_p11, %p3731_p10 }
  0x3b   :  { %3739 = shalt.err (!%p3736_p12)
}
  0x3c   :  { %s3740_s1 = scalar_lea.vmem %s60_s17, 3072  ;;  %p3745_p0 = scmp.lt.s32.totalorder %s60_s17, %s60_s17 }
  0x3d   :  { %p3741_p13 = scmp.ne.s32.totalorder %s60_s17, %s3740_s1  ;;  %p3746_p1 = scmp.lt.s32.totalorder %s3740_s1, %s3740_s1 }
  0x3f   :  { %p3747_p2 = por %p3746_p1, %p3745_p0 }
  0x41   :  { %p3748_p3 = pnand %p3747_p2, %p3741_p13 }
  0x43   :  { %3751 = shalt.err (!%p3748_p3)
}
  0x44   :  { %s3790_s3 = smov 64   ;;  %s3791_s18 = smov 4  }
  0x45   :  { %65 = dma.hbm_to_vmem [thread:$0]  %s3937_s5, 3072, %s60_s17, [#allocation9], %s3790_s3, %s3790_s3, %s3791_s18  }
  0x46   :  { %3774 = dma.done.wait [#allocation3], 896  }
  0x47   :  { %3775 = vsyncadd [#allocation3], 4294966400 }
  0x48   :  { %3776 = dma.done.wait [#allocation6], 37376  }
  0x49   :  { %3777 = vsyncadd [#allocation6], 4294929920 }
  0x4a   :  { %3778 = dma.done.wait [#allocation9], 3072  }
  0x4b   :  { %3779 = vsyncadd [#allocation9], 4294964224  ;;  %v3218_v0 = vld [vmem:[#allocation5 + $0x4] ss:$16 sps:$4 sm:$0xff]   ;;  %v3220_v1 = vld [vmem:[#allocation5 + $0xc] ss:$16 sps:$4 sm:$0xff]  }
  0x4c   :  { %1297 = vmatprep.subr.bf16.mxu0 %v3218_v0  ;;  %v3222_v2 = vld [vmem:[#allocation5] ss:$16 sps:$4 sm:$0xff]   ;;  %v3223_v3 = vld [vmem:[#allocation5 + $0x8] ss:$16 sps:$4 sm:$0xff]   ;;  %1461 = vmatprep.subr.bf16.mxu1 %v3220_v1  ;;  %v3224_v4 = vld [vmem:[#allocation5 + $0x24] ss:$16 sps:$4 sm:$0xff]  }
  0x4d   :  { %1298 = vmatpush1.bf16.msra.mxu0 %v3222_v2  ;;  %1462 = vmatpush1.bf16.msra.mxu1 %v3223_v3  ;;  %v3226_v5 = vld [vmem:[#allocation5 + $0x2c] ss:$16 sps:$4 sm:$0xff]   ;;  %v3228_v6 = vld [vmem:[#allocation5 + $0x20] ss:$16 sps:$4 sm:$0xff]   ;;  %v3229_v7 = vld [vmem:[#allocation5 + $0x28] ss:$16 sps:$4 sm:$0xff]  }
  0x4e   :  { %1299 = vmatprep.subr.bf16.mxu0 %v3224_v4  ;;  %1463 = vmatprep.subr.bf16.mxu1 %v3226_v5  ;;  %v3230_v8 = vld [vmem:[#allocation5 + $0x44] ss:$16 sps:$4 sm:$0xff]   ;;  %v3232_v9 = vld [vmem:[#allocation5 + $0x4c] ss:$16 sps:$4 sm:$0xff]   ;;  %v3234_v10 = vld [vmem:[#allocation5 + $0x40] ss:$16 sps:$4 sm:$0xff]  }
  0x4f   :  { %v3235_v11 = vld [vmem:[#allocation5 + $0x48] ss:$16 sps:$4 sm:$0xff]   ;;  %v3236_v12 = vld [vmem:[#allocation5 + $0x64] ss:$16 sps:$4 sm:$0xff]   ;;  %v3238_v13 = vld [vmem:[#allocation5 + $0x6c] ss:$16 sps:$4 sm:$0xff]  }
  0x50   :  { %v3240_v14 = vld [vmem:[#allocation5 + $0x60] ss:$16 sps:$4 sm:$0xff]   ;;  %v3241_v15 = vld [vmem:[#allocation5 + $0x68] ss:$16 sps:$4 sm:$0xff]   ;;  %v3242_v16 = vld [vmem:[#allocation5 + $0x84] ss:$16 sps:$4 sm:$0xff]  }
  0x51   :  { %1300 = vmatpush1.bf16.msra.mxu0 %v3228_v6  ;;  %1464 = vmatpush1.bf16.msra.mxu1 %v3229_v7  ;;  %v3244_v17 = vld [vmem:[#allocation5 + $0x8c] ss:$16 sps:$4 sm:$0xff]   ;;  %v3246_v18 = vld [vmem:[#allocation5 + $0x80] ss:$16 sps:$4 sm:$0xff]   ;;  %v3247_v19 = vld [vmem:[#allocation5 + $0x88] ss:$16 sps:$4 sm:$0xff]  }
  0x52   :  { %1301 = vmatprep.subr.bf16.mxu0 %v3230_v8  ;;  %1465 = vmatprep.subr.bf16.mxu1 %v3232_v9  ;;  %v3248_v20 = vld [vmem:[#allocation5 + $0xa4] ss:$16 sps:$4 sm:$0xff]   ;;  %v3250_v21 = vld [vmem:[#allocation5 + $0xac] ss:$16 sps:$4 sm:$0xff]   ;;  %v3252_v22 = vld [vmem:[#allocation5 + $0xa0] ss:$16 sps:$4 sm:$0xff]  }
  0x53   :  { %v3253_v23 = vld [vmem:[#allocation5 + $0xa8] ss:$16 sps:$4 sm:$0xff]   ;;  %v3254_v24 = vld [vmem:[#allocation5 + $0xc4] ss:$16 sps:$4 sm:$0xff]   ;;  %v3256_v25 = vld [vmem:[#allocation5 + $0xcc] ss:$16 sps:$4 sm:$0xff]  }
  0x54   :  { %v3258_v26 = vld [vmem:[#allocation5 + $0xc0] ss:$16 sps:$4 sm:$0xff]   ;;  %v3259_v27 = vld [vmem:[#allocation5 + $0xc8] ss:$16 sps:$4 sm:$0xff]   ;;  %v3260_v28 = vld [vmem:[#allocation5 + $0xe4] ss:$16 sps:$4 sm:$0xff]  }
  0x55   :  { %1302 = vmatpush1.bf16.msra.mxu0 %v3234_v10  ;;  %1466 = vmatpush1.bf16.msra.mxu1 %v3235_v11  ;;  %v3262_v29 = vld [vmem:[#allocation5 + $0xec] ss:$16 sps:$4 sm:$0xff]   ;;  %v3264_v30 = vld [vmem:[#allocation5 + $0xe0] ss:$16 sps:$4 sm:$0xff]   ;;  %v3265_v31 = vld [vmem:[#allocation5 + $0xe8] ss:$16 sps:$4 sm:$0xff]  }
  0x56   :  { %1303 = vmatprep.subr.bf16.mxu0 %v3236_v12  ;;  %1467 = vmatprep.subr.bf16.mxu1 %v3238_v13  ;;  %v3266_v32 = vld [vmem:[#allocation5 + $0x104] ss:$16 sps:$4 sm:$0xff]   ;;  %v3268_v33 = vld [vmem:[#allocation5 + $0x10c] ss:$16 sps:$4 sm:$0xff]   ;;  %v3270_v34 = vld [vmem:[#allocation5 + $0x100] ss:$16 sps:$4 sm:$0xff]  }
  0x57   :  { %v3271_v35 = vld [vmem:[#allocation5 + $0x108] ss:$16 sps:$4 sm:$0xff]   ;;  %v3272_v36 = vld [vmem:[#allocation5 + $0x124] ss:$16 sps:$4 sm:$0xff]   ;;  %v3274_v37 = vld [vmem:[#allocation5 + $0x12c] ss:$16 sps:$4 sm:$0xff]  }
  0x58   :  { %v3276_v38 = vld [vmem:[#allocation5 + $0x120] ss:$16 sps:$4 sm:$0xff]   ;;  %v3277_v39 = vld [vmem:[#allocation5 + $0x128] ss:$16 sps:$4 sm:$0xff]   ;;  %v3278_v40 = vld [vmem:[#allocation5 + $0x144] ss:$16 sps:$4 sm:$0xff]  }
  0x59   :  { %1304 = vmatpush1.bf16.msra.mxu0 %v3240_v14  ;;  %1468 = vmatpush1.bf16.msra.mxu1 %v3241_v15  ;;  %v3280_v41 = vld [vmem:[#allocation5 + $0x14c] ss:$16 sps:$4 sm:$0xff]   ;;  %v3282_v42 = vld [vmem:[#allocation5 + $0x140] ss:$16 sps:$4 sm:$0xff]   ;;  %v3283_v43 = vld [vmem:[#allocation5 + $0x148] ss:$16 sps:$4 sm:$0xff]  }
  0x5a   :  { %1305 = vmatprep.subr.bf16.mxu0 %v3242_v16  ;;  %1469 = vmatprep.subr.bf16.mxu1 %v3244_v17  ;;  %v3284_v44 = vld [vmem:[#allocation5 + $0x164] ss:$16 sps:$4 sm:$0xff]   ;;  %v3286_v45 = vld [vmem:[#allocation5 + $0x16c] ss:$16 sps:$4 sm:$0xff]   ;;  %v3288_v47 = vld [vmem:[#allocation5 + $0x160] ss:$16 sps:$4 sm:$0xff]  }
  0x5b   :  { %v82_v46 = vld [vmem:[#allocation2 + $0x8] sm:$0xff]  ;;  %v3289_v49 = vld [vmem:[#allocation5 + $0x168] ss:$16 sps:$4 sm:$0xff]   ;;  %v3292_v51 = vld [vmem:[#allocation5 + $0x18c] ss:$16 sps:$4 sm:$0xff]   ;;  %vm1293_vm0 = vcmask 130048  }
  0x5c   :  { %v89_v48 = vpack.c.bf16 %v82_v46, %v82_v46  ;;  %v3290_v50 = vld [vmem:[#allocation5 + $0x184] ss:$16 sps:$4 sm:$0xff]   ;;  %v3294_v52 = vld [vmem:[#allocation5 + $0x180] ss:$16 sps:$4 sm:$0xff]   ;;  %v3295_v53 = vld [vmem:[#allocation5 + $0x188] ss:$16 sps:$4 sm:$0xff]  }
  0x5d   :  { %1306 = vmatpush1.bf16.msra.mxu0 %v3246_v18  ;;  %1470 = vmatpush1.bf16.msra.mxu1 %v3247_v19  ;;  %v3296_v54 = vld [vmem:[#allocation5 + $0x1a4] ss:$16 sps:$4 sm:$0xff]   ;;  %v3298_v55 = vld [vmem:[#allocation5 + $0x1ac] ss:$16 sps:$4 sm:$0xff]   ;;  %v3300_v56 = vld [vmem:[#allocation5 + $0x1a0] ss:$16 sps:$4 sm:$0xff]  }
  0x5e   :  { %1307 = vmatprep.subr.bf16.mxu0 %v3248_v20  ;;  %1471 = vmatprep.subr.bf16.mxu1 %v3250_v21  ;;  %v3301_v57 = vld [vmem:[#allocation5 + $0x1a8] ss:$16 sps:$4 sm:$0xff]   ;;  %v3302_v58 = vld [vmem:[#allocation5 + $0x1c4] ss:$16 sps:$4 sm:$0xff]   ;;  %v3304_v59 = vld [vmem:[#allocation5 + $0x1cc] ss:$16 sps:$4 sm:$0xff]  }
  0x5f   :  { %1329 = vmatprep.mubr.bf16.mxu0 %v89_v48  ;;  %1493 = vmatprep.mubr.bf16.mxu1 %v89_v48  ;;  %v3306_v60 = vld [vmem:[#allocation5 + $0x1c0] ss:$16 sps:$4 sm:$0xff]   ;;  %v3307_v61 = vld [vmem:[#allocation5 + $0x1c8] ss:$16 sps:$4 sm:$0xff]   ;;  %v3308_v62 = vld [vmem:[#allocation5 + $0x1e4] ss:$16 sps:$4 sm:$0xff]  }
  0x60   :  { %v3310_v63 = vld [vmem:[#allocation5 + $0x1ec] ss:$16 sps:$4 sm:$0xff]   ;;  %v3312_v0 = vld [vmem:[#allocation5 + $0x1e0] ss:$16 sps:$4 sm:$0xff]   ;;  %v3313_v1 = vld [vmem:[#allocation5 + $0x1e8] ss:$16 sps:$4 sm:$0xff]  }
  0x61   :  { %1308 = vmatpush1.bf16.msra.mxu0 %v3252_v22  ;;  %1472 = vmatpush1.bf16.msra.mxu1 %v3253_v23  ;;  %v81_v2 = vld [vmem:[#allocation2] sm:$0xff]  ;;  %v3316_v3 = vld [vmem:[#allocation5 + $0x204] ss:$16 sps:$4 sm:$0xff]   ;;  %v3314_v6 = vld [vmem:[#allocation5 + $0x200] ss:$16 sps:$4 sm:$0xff]   ;;  %vm3794_vm1 = vmmov 0  }
  0x62   :  { %1309 = vmatprep.subr.bf16.mxu0 %v3254_v24  ;;  %1473 = vmatprep.subr.bf16.mxu1 %v3256_v25  ;;  %v3319_v4 = vld [vmem:[#allocation5 + $0x20c] ss:$16 sps:$4 sm:$0xff]   ;;  %v88_v5 = vpack.c.bf16 %v81_v2, %v81_v2  ;;  %v3317_v7 = vld [vmem:[#allocation5 + $0x208] ss:$16 sps:$4 sm:$0xff]   ;;  %v3322_v8 = vld [vmem:[#allocation5 + $0x224] ss:$16 sps:$4 sm:$0xff]  }
  0x63   :  { %v3325_v9 = vld [vmem:[#allocation5 + $0x22c] ss:$16 sps:$4 sm:$0xff]   ;;  %v3320_v10 = vld [vmem:[#allocation5 + $0x220] ss:$16 sps:$4 sm:$0xff]   ;;  %v3323_v11 = vld [vmem:[#allocation5 + $0x228] ss:$16 sps:$4 sm:$0xff]  }
  0x64   :  { %v3328_v12 = vld [vmem:[#allocation5 + $0x244] ss:$16 sps:$4 sm:$0xff]   ;;  %v3331_v13 = vld [vmem:[#allocation5 + $0x24c] ss:$16 sps:$4 sm:$0xff]   ;;  %v3326_v14 = vld [vmem:[#allocation5 + $0x240] ss:$16 sps:$4 sm:$0xff]  }
  0x65   :  { %1310 = vmatpush1.bf16.msra.mxu0 %v3258_v26  ;;  %1474 = vmatpush1.bf16.msra.mxu1 %v3259_v27  ;;  %v3329_v15 = vld [vmem:[#allocation5 + $0x248] ss:$16 sps:$4 sm:$0xff]   ;;  %v3334_v16 = vld [vmem:[#allocation5 + $0x264] ss:$16 sps:$4 sm:$0xff]   ;;  %v3337_v17 = vld [vmem:[#allocation5 + $0x26c] ss:$16 sps:$4 sm:$0xff]  }
  0x66   :  { %1311 = vmatprep.subr.bf16.mxu0 %v3260_v28  ;;  %1475 = vmatprep.subr.bf16.mxu1 %v3262_v29  ;;  %v3332_v18 = vld [vmem:[#allocation5 + $0x260] ss:$16 sps:$4 sm:$0xff]   ;;  %v3335_v19 = vld [vmem:[#allocation5 + $0x268] ss:$16 sps:$4 sm:$0xff]   ;;  %v3340_v20 = vld [vmem:[#allocation5 + $0x284] ss:$16 sps:$4 sm:$0xff]  }
  0x67   :  { %v3343_v21 = vld [vmem:[#allocation5 + $0x28c] ss:$16 sps:$4 sm:$0xff]   ;;  %v3338_v22 = vld [vmem:[#allocation5 + $0x280] ss:$16 sps:$4 sm:$0xff]   ;;  %v3341_v23 = vld [vmem:[#allocation5 + $0x288] ss:$16 sps:$4 sm:$0xff]  }
  0x68   :  { %v3346_v24 = vld [vmem:[#allocation5 + $0x2a4] ss:$16 sps:$4 sm:$0xff]   ;;  %v3349_v25 = vld [vmem:[#allocation5 + $0x2ac] ss:$16 sps:$4 sm:$0xff]   ;;  %v3344_v26 = vld [vmem:[#allocation5 + $0x2a0] ss:$16 sps:$4 sm:$0xff]  }
  0x69   :  { %1312 = vmatpush1.bf16.msra.mxu0 %v3264_v30  ;;  %1476 = vmatpush1.bf16.msra.mxu1 %v3265_v31  ;;  %v3347_v27 = vld [vmem:[#allocation5 + $0x2a8] ss:$16 sps:$4 sm:$0xff]   ;;  %v3352_v28 = vld [vmem:[#allocation5 + $0x2c4] ss:$16 sps:$4 sm:$0xff]   ;;  %v3355_v29 = vld [vmem:[#allocation5 + $0x2cc] ss:$16 sps:$4 sm:$0xff]  }
  0x6a   :  { %1313 = vmatprep.subr.bf16.mxu0 %v3266_v32  ;;  %1477 = vmatprep.subr.bf16.mxu1 %v3268_v33  ;;  %v84_v30 = vld [vmem:[#allocation2 + $0x18] sm:$0xff]  ;;  %v3353_v33 = vld [vmem:[#allocation5 + $0x2c8] ss:$16 sps:$4 sm:$0xff]   ;;  %s3795_s8 = smov [#allocation10]  }
  0x6b   :  { %v3350_v31 = vld [vmem:[#allocation5 + $0x2c0] ss:$16 sps:$4 sm:$0xff]   ;;  %v91_v32 = vpack.c.bf16 %v84_v30, %v84_v30  ;;  %v3376_v46 = vld [vmem:[#allocation5 + $0x344] ss:$16 sps:$4 sm:$0xff]   ;;  %s2745_s9 = sshll.u32 %s3795_s8, 4  ;;  %s2746_s9 = int_to_ptr.vmem [resolvable:$true] %s2745_s9 }
  0x6c   :  { %v3374_v48 = vld [vmem:[#allocation5 + $0x340] ss:$16 sps:$4 sm:$0xff]   ;;  %v3406_v2 = vld [vmem:[#allocation5 + $0x3e4] ss:$16 sps:$4 sm:$0xff]   ;;  %s3752_s10 = scalar_lea.vmem %s2746_s9, 64  ;;  %p3757_p5 = scmp.lt.s32.totalorder %s2746_s9, %s2746_s9 }
  0x6d   :  { %1314 = vmatpush1.bf16.msra.mxu0 %v3270_v34  ;;  %1478 = vmatpush1.bf16.msra.mxu1 %v3271_v35  ;;  %v3358_v34 = vld [vmem:[#allocation5 + $0x2e4] ss:$16 sps:$4 sm:$0xff]   ;;  %v3361_v35 = vld [vmem:[#allocation5 + $0x2ec] ss:$16 sps:$4 sm:$0xff]   ;;  %p3753_p4 = scmp.ne.s32.totalorder %s2746_s9, %s3752_s10  ;;  %p3758_p6 = scmp.lt.s32.totalorder %s3752_s10, %s3752_s10 }
  0x6e   :  { %1315 = vmatprep.subr.bf16.mxu0 %v3272_v36  ;;  %1479 = vmatprep.subr.bf16.mxu1 %v3274_v37  ;;  %v3356_v36 = vld [vmem:[#allocation5 + $0x2e0] ss:$16 sps:$4 sm:$0xff]   ;;  %v3359_v37 = vld [vmem:[#allocation5 + $0x2e8] ss:$16 sps:$4 sm:$0xff]   ;;  %v3442_v30 = vld [vmem:[#allocation5 + $0x4a4] ss:$16 sps:$4 sm:$0xff]  }
  0x6f   :  { %p3759_p7 = por %p3758_p6, %p3757_p5 }
  0x71   :  { %1316 = vmatpush1.bf16.msra.mxu0 %v3276_v38  ;;  %1480 = vmatpush1.bf16.msra.mxu1 %v3277_v39  ;;  %v3364_v38 = vld [vmem:[#allocation5 + $0x304] ss:$16 sps:$4 sm:$0xff]   ;;  %v3367_v39 = vld [vmem:[#allocation5 + $0x30c] ss:$16 sps:$4 sm:$0xff]   ;;  %p3760_p8 = pnand %p3759_p7, %p3753_p4 }
  0x72   :  { %1317 = vmatprep.subr.bf16.mxu0 %v3278_v40  ;;  %1481 = vmatprep.subr.bf16.mxu1 %v3280_v41  ;;  %v3362_v40 = vld [vmem:[#allocation5 + $0x300] ss:$16 sps:$4 sm:$0xff]   ;;  %v3365_v41 = vld [vmem:[#allocation5 + $0x308] ss:$16 sps:$4 sm:$0xff]  }
  0x75   :  { %1318 = vmatpush1.bf16.msra.mxu0 %v3282_v42  ;;  %1482 = vmatpush1.bf16.msra.mxu1 %v3283_v43  ;;  %v3370_v42 = vld [vmem:[#allocation5 + $0x324] ss:$16 sps:$4 sm:$0xff]   ;;  %v3373_v43 = vld [vmem:[#allocation5 + $0x32c] ss:$16 sps:$4 sm:$0xff]  }
  0x76   :  { %1319 = vmatprep.subr.bf16.mxu0 %v3284_v44  ;;  %1483 = vmatprep.subr.bf16.mxu1 %v3286_v45  ;;  %v3368_v44 = vld [vmem:[#allocation5 + $0x320] ss:$16 sps:$4 sm:$0xff]   ;;  %v3371_v45 = vld [vmem:[#allocation5 + $0x328] ss:$16 sps:$4 sm:$0xff]  }
  0x79   :  { %1320 = vmatpush1.bf16.msra.mxu0 %v3288_v47  ;;  %1484 = vmatpush1.bf16.msra.mxu1 %v3289_v49  ;;  %v3379_v47 = vld [vmem:[#allocation5 + $0x34c] ss:$16 sps:$4 sm:$0xff]   ;;  %v3377_v49 = vld [vmem:[#allocation5 + $0x348] ss:$16 sps:$4 sm:$0xff]  }
  0x7a   :  { %1321 = vmatprep.subr.bf16.mxu0 %v3290_v50  ;;  %1485 = vmatprep.subr.bf16.mxu1 %v3292_v51  ;;  %v3382_v50 = vld [vmem:[#allocation5 + $0x364] ss:$16 sps:$4 sm:$0xff]   ;;  %v3385_v51 = vld [vmem:[#allocation5 + $0x36c] ss:$16 sps:$4 sm:$0xff]  }
  0x7d   :  { %1322 = vmatpush1.bf16.msra.mxu0 %v3294_v52  ;;  %1486 = vmatpush1.bf16.msra.mxu1 %v3295_v53  ;;  %v3380_v52 = vld [vmem:[#allocation5 + $0x360] ss:$16 sps:$4 sm:$0xff]   ;;  %v3383_v53 = vld [vmem:[#allocation5 + $0x368] ss:$16 sps:$4 sm:$0xff]  }
  0x7e   :  { %1323 = vmatprep.subr.bf16.mxu0 %v3296_v54  ;;  %1487 = vmatprep.subr.bf16.mxu1 %v3298_v55  ;;  %v3388_v54 = vld [vmem:[#allocation5 + $0x384] ss:$16 sps:$4 sm:$0xff]   ;;  %v3391_v55 = vld [vmem:[#allocation5 + $0x38c] ss:$16 sps:$4 sm:$0xff]  }
  0x81   :  { %1324 = vmatpush1.bf16.msra.mxu0 %v3300_v56  ;;  %1488 = vmatpush1.bf16.msra.mxu1 %v3301_v57  ;;  %v3386_v56 = vld [vmem:[#allocation5 + $0x380] ss:$16 sps:$4 sm:$0xff]   ;;  %v3389_v57 = vld [vmem:[#allocation5 + $0x388] ss:$16 sps:$4 sm:$0xff]  }
  0x82   :  { %1325 = vmatprep.subr.bf16.mxu0 %v3302_v58  ;;  %1489 = vmatprep.subr.bf16.mxu1 %v3304_v59  ;;  %v3394_v58 = vld [vmem:[#allocation5 + $0x3a4] ss:$16 sps:$4 sm:$0xff]   ;;  %v3397_v59 = vld [vmem:[#allocation5 + $0x3ac] ss:$16 sps:$4 sm:$0xff]  }
  0x85   :  { %1326 = vmatpush1.bf16.msra.mxu0 %v3306_v60  ;;  %1490 = vmatpush1.bf16.msra.mxu1 %v3307_v61  ;;  %v3392_v60 = vld [vmem:[#allocation5 + $0x3a0] ss:$16 sps:$4 sm:$0xff]   ;;  %v3395_v61 = vld [vmem:[#allocation5 + $0x3a8] ss:$16 sps:$4 sm:$0xff]  }
  0x86   :  { %1327 = vmatprep.subr.bf16.mxu0 %v3308_v62  ;;  %1491 = vmatprep.subr.bf16.mxu1 %v3310_v63  ;;  %v3400_v62 = vld [vmem:[#allocation5 + $0x3c4] ss:$16 sps:$4 sm:$0xff]   ;;  %v3403_v63 = vld [vmem:[#allocation5 + $0x3cc] ss:$16 sps:$4 sm:$0xff]  }
  0x89   :  { %1328 = vmatpush1.bf16.msra.mxu0 %v3312_v0  ;;  %1492 = vmatpush1.bf16.msra.mxu1 %v3313_v1  ;;  %v3398_v0 = vld [vmem:[#allocation5 + $0x3c0] ss:$16 sps:$4 sm:$0xff]   ;;  %v3401_v1 = vld [vmem:[#allocation5 + $0x3c8] ss:$16 sps:$4 sm:$0xff]  }
  0x8a   :  { %1338 = vmatprep.subr.bf16.mxu0 %v3316_v3  ;;  %1502 = vmatprep.subr.bf16.mxu1 %v3319_v4  ;;  %v3409_v3 = vld [vmem:[#allocation5 + $0x3ec] ss:$16 sps:$4 sm:$0xff]   ;;  %v3404_v4 = vld [vmem:[#allocation5 + $0x3e0] ss:$16 sps:$4 sm:$0xff]  }
  0x8c   :  { %1330 = vmatmul.mubr.bf16.vlgmr.msra.gmra.mrb[0].mxu0 %v88_v5  ;;  %1494 = vmatmul.mubr.bf16.vlgmr.msra.gmra.mrb[0].mxu1 %v88_v5  ;;  %v3407_v5 = vld [vmem:[#allocation5 + $0x3e8] ss:$16 sps:$4 sm:$0xff]  }
  0x8d   :  { %1339 = vmatpush1.bf16.msra.mxu0 %v3314_v6  ;;  %1503 = vmatpush1.bf16.msra.mxu1 %v3317_v7  ;;  %v3412_v6 = vld [vmem:[#allocation5 + $0x404] ss:$16 sps:$4 sm:$0xff]   ;;  %v83_v7 = vld [vmem:[#allocation2 + $0x10] sm:$0xff] }
  0x8e   :  { %1340 = vmatprep.subr.bf16.mxu0 %v3322_v8  ;;  %1504 = vmatprep.subr.bf16.mxu1 %v3325_v9  ;;  %v3415_v8 = vld [vmem:[#allocation5 + $0x40c] ss:$16 sps:$4 sm:$0xff]   ;;  %v3410_v9 = vld [vmem:[#allocation5 + $0x400] ss:$16 sps:$4 sm:$0xff]  }
  0x8f   :  { %1370 = vmatprep.mubr.bf16.mxu0 %v91_v32  ;;  %1534 = vmatprep.mubr.bf16.mxu1 %v91_v32  ;;  %v3440_v32 = vld [vmem:[#allocation5 + $0x4a0] ss:$16 sps:$4 sm:$0xff]  }
  0x91   :  { %1341 = vmatpush1.bf16.msra.mxu0 %v3320_v10  ;;  %1505 = vmatpush1.bf16.msra.mxu1 %v3323_v11  ;;  %v90_v10 = vpack.c.bf16 %v83_v7, %v83_v7  ;;  %v3413_v11 = vld [vmem:[#allocation5 + $0x408] ss:$16 sps:$4 sm:$0xff]   ;;  %v3505_v7 = vld [vmem:[#allocation5 + $0x5ec] ss:$16 sps:$4 sm:$0xff]  }
  0x92   :  { %1342 = vmatprep.subr.bf16.mxu0 %v3328_v12  ;;  %1506 = vmatprep.subr.bf16.mxu1 %v3331_v13  ;;  %v3418_v12 = vld [vmem:[#allocation5 + $0x424] ss:$16 sps:$4 sm:$0xff]   ;;  %v3421_v13 = vld [vmem:[#allocation5 + $0x42c] ss:$16 sps:$4 sm:$0xff]  }
  0x95   :  { %1343 = vmatpush1.bf16.msra.mxu0 %v3326_v14  ;;  %1507 = vmatpush1.bf16.msra.mxu1 %v3329_v15  ;;  %v86_v14 = vld [vmem:[#allocation2 + $0x28] sm:$0xff] }
  0x96   :  { %1344 = vmatprep.subr.bf16.mxu0 %v3334_v16  ;;  %1508 = vmatprep.subr.bf16.mxu1 %v3337_v17  ;;  %v93_v15 = vpack.c.bf16 %v86_v14, %v86_v14  ;;  %v3416_v16 = vld [vmem:[#allocation5 + $0x420] ss:$16 sps:$4 sm:$0xff]   ;;  %v3419_v17 = vld [vmem:[#allocation5 + $0x428] ss:$16 sps:$4 sm:$0xff]  }
  0x97   :  { %v3509_v14 = vld [vmem:[#allocation5 + $0x608] ss:$16 sps:$4 sm:$0xff]  }
  0x99   :  { %1345 = vmatpush1.bf16.msra.mxu0 %v3332_v18  ;;  %1509 = vmatpush1.bf16.msra.mxu1 %v3335_v19  ;;  %v3424_v18 = vld [vmem:[#allocation5 + $0x444] ss:$16 sps:$4 sm:$0xff]   ;;  %v3427_v19 = vld [vmem:[#allocation5 + $0x44c] ss:$16 sps:$4 sm:$0xff]  }
  0x9a   :  { %1346 = vmatprep.subr.bf16.mxu0 %v3340_v20  ;;  %1510 = vmatprep.subr.bf16.mxu1 %v3343_v21  ;;  %v3422_v20 = vld [vmem:[#allocation5 + $0x440] ss:$16 sps:$4 sm:$0xff]   ;;  %v3425_v21 = vld [vmem:[#allocation5 + $0x448] ss:$16 sps:$4 sm:$0xff]  }
  0x9d   :  { %1347 = vmatpush1.bf16.msra.mxu0 %v3338_v22  ;;  %1511 = vmatpush1.bf16.msra.mxu1 %v3341_v23  ;;  %v3430_v22 = vld [vmem:[#allocation5 + $0x464] ss:$16 sps:$4 sm:$0xff]   ;;  %v3433_v23 = vld [vmem:[#allocation5 + $0x46c] ss:$16 sps:$4 sm:$0xff]  }
  0x9e   :  { %1348 = vmatprep.subr.bf16.mxu0 %v3346_v24  ;;  %1512 = vmatprep.subr.bf16.mxu1 %v3349_v25  ;;  %v3428_v24 = vld [vmem:[#allocation5 + $0x460] ss:$16 sps:$4 sm:$0xff]   ;;  %v3431_v25 = vld [vmem:[#allocation5 + $0x468] ss:$16 sps:$4 sm:$0xff]  }
  0xa1   :  { %1349 = vmatpush1.bf16.msra.mxu0 %v3344_v26  ;;  %1513 = vmatpush1.bf16.msra.mxu1 %v3347_v27  ;;  %v3436_v26 = vld [vmem:[#allocation5 + $0x484] ss:$16 sps:$4 sm:$0xff]   ;;  %v3439_v27 = vld [vmem:[#allocation5 + $0x48c] ss:$16 sps:$4 sm:$0xff]  }
  0xa2   :  { %1350 = vmatprep.subr.bf16.mxu0 %v3352_v28  ;;  %1514 = vmatprep.subr.bf16.mxu1 %v3355_v29  ;;  %v3434_v28 = vld [vmem:[#allocation5 + $0x480] ss:$16 sps:$4 sm:$0xff]   ;;  %v3437_v29 = vld [vmem:[#allocation5 + $0x488] ss:$16 sps:$4 sm:$0xff]  }
  0xa5   :  { %1351 = vmatpush1.bf16.msra.mxu0 %v3350_v31  ;;  %1515 = vmatpush1.bf16.msra.mxu1 %v3353_v33  ;;  %v3445_v31 = vld [vmem:[#allocation5 + $0x4ac] ss:$16 sps:$4 sm:$0xff]   ;;  %v3443_v33 = vld [vmem:[#allocation5 + $0x4a8] ss:$16 sps:$4 sm:$0xff]  }
  0xa6   :  { %1352 = vmatprep.subr.bf16.mxu0 %v3358_v34  ;;  %1516 = vmatprep.subr.bf16.mxu1 %v3361_v35  ;;  %v3448_v34 = vld [vmem:[#allocation5 + $0x4c4] ss:$16 sps:$4 sm:$0xff]   ;;  %v3451_v35 = vld [vmem:[#allocation5 + $0x4cc] ss:$16 sps:$4 sm:$0xff]  }
  0xa9   :  { %1353 = vmatpush1.bf16.msra.mxu0 %v3356_v36  ;;  %1517 = vmatpush1.bf16.msra.mxu1 %v3359_v37  ;;  %v3446_v36 = vld [vmem:[#allocation5 + $0x4c0] ss:$16 sps:$4 sm:$0xff]   ;;  %v3449_v37 = vld [vmem:[#allocation5 + $0x4c8] ss:$16 sps:$4 sm:$0xff]  }
  0xaa   :  { %1354 = vmatprep.subr.bf16.mxu0 %v3364_v38  ;;  %1518 = vmatprep.subr.bf16.mxu1 %v3367_v39  ;;  %v3454_v38 = vld [vmem:[#allocation5 + $0x4e4] ss:$16 sps:$4 sm:$0xff]   ;;  %v3457_v39 = vld [vmem:[#allocation5 + $0x4ec] ss:$16 sps:$4 sm:$0xff]  }
  0xad   :  { %1355 = vmatpush1.bf16.msra.mxu0 %v3362_v40  ;;  %1519 = vmatpush1.bf16.msra.mxu1 %v3365_v41  ;;  %v3452_v40 = vld [vmem:[#allocation5 + $0x4e0] ss:$16 sps:$4 sm:$0xff]   ;;  %v3455_v41 = vld [vmem:[#allocation5 + $0x4e8] ss:$16 sps:$4 sm:$0xff]  }
  0xae   :  { %1356 = vmatprep.subr.bf16.mxu0 %v3370_v42  ;;  %1520 = vmatprep.subr.bf16.mxu1 %v3373_v43  ;;  %v3460_v42 = vld [vmem:[#allocation5 + $0x504] ss:$16 sps:$4 sm:$0xff]   ;;  %v3463_v43 = vld [vmem:[#allocation5 + $0x50c] ss:$16 sps:$4 sm:$0xff]  }
  0xb1   :  { %1357 = vmatpush1.bf16.msra.mxu0 %v3368_v44  ;;  %1521 = vmatpush1.bf16.msra.mxu1 %v3371_v45  ;;  %v3458_v44 = vld [vmem:[#allocation5 + $0x500] ss:$16 sps:$4 sm:$0xff]   ;;  %v3461_v45 = vld [vmem:[#allocation5 + $0x508] ss:$16 sps:$4 sm:$0xff]  }
  0xb2   :  { %1358 = vmatprep.subr.bf16.mxu0 %v3376_v46  ;;  %1522 = vmatprep.subr.bf16.mxu1 %v3379_v47  ;;  %v3466_v46 = vld [vmem:[#allocation5 + $0x524] ss:$16 sps:$4 sm:$0xff]   ;;  %v3469_v47 = vld [vmem:[#allocation5 + $0x52c] ss:$16 sps:$4 sm:$0xff]  }
  0xb5   :  { %1359 = vmatpush1.bf16.msra.mxu0 %v3374_v48  ;;  %1523 = vmatpush1.bf16.msra.mxu1 %v3377_v49  ;;  %v3464_v48 = vld [vmem:[#allocation5 + $0x520] ss:$16 sps:$4 sm:$0xff]   ;;  %v3467_v49 = vld [vmem:[#allocation5 + $0x528] ss:$16 sps:$4 sm:$0xff]  }
  0xb6   :  { %1360 = vmatprep.subr.bf16.mxu0 %v3382_v50  ;;  %1524 = vmatprep.subr.bf16.mxu1 %v3385_v51  ;;  %v3472_v50 = vld [vmem:[#allocation5 + $0x544] ss:$16 sps:$4 sm:$0xff]   ;;  %v3475_v51 = vld [vmem:[#allocation5 + $0x54c] ss:$16 sps:$4 sm:$0xff]  }
  0xb9   :  { %1361 = vmatpush1.bf16.msra.mxu0 %v3380_v52  ;;  %1525 = vmatpush1.bf16.msra.mxu1 %v3383_v53  ;;  %v3470_v52 = vld [vmem:[#allocation5 + $0x540] ss:$16 sps:$4 sm:$0xff]   ;;  %v3473_v53 = vld [vmem:[#allocation5 + $0x548] ss:$16 sps:$4 sm:$0xff]  }
  0xba   :  { %1362 = vmatprep.subr.bf16.mxu0 %v3388_v54  ;;  %1526 = vmatprep.subr.bf16.mxu1 %v3391_v55  ;;  %v3478_v54 = vld [vmem:[#allocation5 + $0x564] ss:$16 sps:$4 sm:$0xff]   ;;  %v3481_v55 = vld [vmem:[#allocation5 + $0x56c] ss:$16 sps:$4 sm:$0xff]  }
  0xbd   :  { %1363 = vmatpush1.bf16.msra.mxu0 %v3386_v56  ;;  %1527 = vmatpush1.bf16.msra.mxu1 %v3389_v57  ;;  %v3476_v56 = vld [vmem:[#allocation5 + $0x560] ss:$16 sps:$4 sm:$0xff]   ;;  %v3479_v57 = vld [vmem:[#allocation5 + $0x568] ss:$16 sps:$4 sm:$0xff]  }
  0xbe   :  { %1364 = vmatprep.subr.bf16.mxu0 %v3394_v58  ;;  %1528 = vmatprep.subr.bf16.mxu1 %v3397_v59  ;;  %v3484_v58 = vld [vmem:[#allocation5 + $0x584] ss:$16 sps:$4 sm:$0xff]   ;;  %v3487_v59 = vld [vmem:[#allocation5 + $0x58c] ss:$16 sps:$4 sm:$0xff]  }
  0xc1   :  { %1365 = vmatpush1.bf16.msra.mxu0 %v3392_v60  ;;  %1529 = vmatpush1.bf16.msra.mxu1 %v3395_v61  ;;  %v3482_v60 = vld [vmem:[#allocation5 + $0x580] ss:$16 sps:$4 sm:$0xff]   ;;  %v3485_v61 = vld [vmem:[#allocation5 + $0x588] ss:$16 sps:$4 sm:$0xff]  }
  0xc2   :  { %1366 = vmatprep.subr.bf16.mxu0 %v3400_v62  ;;  %1530 = vmatprep.subr.bf16.mxu1 %v3403_v63  ;;  %v3490_v62 = vld [vmem:[#allocation5 + $0x5a4] ss:$16 sps:$4 sm:$0xff]   ;;  %v3493_v63 = vld [vmem:[#allocation5 + $0x5ac] ss:$16 sps:$4 sm:$0xff]  }
  0xc5   :  { %1367 = vmatpush1.bf16.msra.mxu0 %v3398_v0  ;;  %1531 = vmatpush1.bf16.msra.mxu1 %v3401_v1  ;;  %v3488_v0 = vld [vmem:[#allocation5 + $0x5a0] ss:$16 sps:$4 sm:$0xff]   ;;  %v3491_v1 = vld [vmem:[#allocation5 + $0x5a8] ss:$16 sps:$4 sm:$0xff]  }
  0xc6   :  { %1368 = vmatprep.subr.bf16.mxu0 %v3406_v2  ;;  %1532 = vmatprep.subr.bf16.mxu1 %v3409_v3  ;;  %v3496_v2 = vld [vmem:[#allocation5 + $0x5c4] ss:$16 sps:$4 sm:$0xff]   ;;  %v3499_v3 = vld [vmem:[#allocation5 + $0x5cc] ss:$16 sps:$4 sm:$0xff]  }
  0xc9   :  { %1369 = vmatpush1.bf16.msra.mxu0 %v3404_v4  ;;  %1533 = vmatpush1.bf16.msra.mxu1 %v3407_v5  ;;  %v3494_v4 = vld [vmem:[#allocation5 + $0x5c0] ss:$16 sps:$4 sm:$0xff]   ;;  %v3497_v5 = vld [vmem:[#allocation5 + $0x5c8] ss:$16 sps:$4 sm:$0xff]  }
  0xca   :  { %1379 = vmatprep.subr.bf16.mxu0 %v3412_v6  ;;  %1543 = vmatprep.subr.bf16.mxu1 %v3415_v8  ;;  %v3502_v6 = vld [vmem:[#allocation5 + $0x5e4] ss:$16 sps:$4 sm:$0xff]   ;;  %v3500_v8 = vld [vmem:[#allocation5 + $0x5e0] ss:$16 sps:$4 sm:$0xff]  }
  0xcc   :  { %1371 = vmatmul.mubr.bf16.vlgmr.msra.gmra.mrb[0].mxu0 %v90_v10  ;;  %1535 = vmatmul.mubr.bf16.vlgmr.msra.gmra.mrb[0].mxu1 %v90_v10  ;;  %v85_v10 = vld [vmem:[#allocation2 + $0x20] sm:$0xff] }
  0xcd   :  { %1380 = vmatpush1.bf16.msra.mxu0 %v3410_v9  ;;  %1544 = vmatpush1.bf16.msra.mxu1 %v3413_v11  ;;  %v3503_v9 = vld [vmem:[#allocation5 + $0x5e8] ss:$16 sps:$4 sm:$0xff]   ;;  %v3508_v11 = vld [vmem:[#allocation5 + $0x604] ss:$16 sps:$4 sm:$0xff]  }
  0xce   :  { %1381 = vmatprep.subr.bf16.mxu0 %v3418_v12  ;;  %1545 = vmatprep.subr.bf16.mxu1 %v3421_v13  ;;  %v3511_v12 = vld [vmem:[#allocation5 + $0x60c] ss:$16 sps:$4 sm:$0xff]   ;;  %v3506_v13 = vld [vmem:[#allocation5 + $0x600] ss:$16 sps:$4 sm:$0xff]  }
  0xcf   :  { %1411 = vmatprep.mubr.bf16.mxu0 %v93_v15  ;;  %1575 = vmatprep.mubr.bf16.mxu1 %v93_v15  ;;  %v92_v15 = vpack.c.bf16 %v85_v10, %v85_v10 }
  0xd1   :  { %1382 = vmatpush1.bf16.msra.mxu0 %v3416_v16  ;;  %1546 = vmatpush1.bf16.msra.mxu1 %v3419_v17  ;;  %v3514_v16 = vld [vmem:[#allocation7 + $0x4] ss:$12 sps:$4 sm:$0xff]   ;;  %v3539_v17 = vld [vmem:[#allocation7 + $0xc8] ss:$12 sps:$4 sm:$0xff]  }
  0xd2   :  { %1383 = vmatprep.subr.bf16.mxu0 %v3424_v18  ;;  %1547 = vmatprep.subr.bf16.mxu1 %v3427_v19  ;;  %v3792_v18 = vmov 0   ;;  %v87_v19 = vld [vmem:[#allocation2 + $0x30] sm:$0xff] }
  0xd5   :  { %1384 = vmatpush1.bf16.msra.mxu0 %v3422_v20  ;;  %1548 = vmatpush1.bf16.msra.mxu1 %v3425_v21  ;;  %v3512_v20 = vld [vmem:[#allocation7] ss:$12 sps:$4 sm:$0xff]   ;;  %v3540_v21 = vld [vmem:[#allocation7 + $0x8] ss:$12 sps:$4 sm:$0xff]  }
  0xd6   :  { %1385 = vmatprep.subr.bf16.mxu0 %v3430_v22  ;;  %1549 = vmatprep.subr.bf16.mxu1 %v3433_v23  ;;  %v94_v22 = vpack.c.bf16 %v87_v19, %v87_v19  ;;  %v3517_v23 = vld [vmem:[#allocation7 + $0x1c] ss:$12 sps:$4 sm:$0xff]  }
  0xd9   :  { %1386 = vmatpush1.bf16.msra.mxu0 %v3428_v24  ;;  %1550 = vmatpush1.bf16.msra.mxu1 %v3431_v25  ;;  %v3544_v24 = vld [vmem:[#allocation7 + $0xe0] ss:$12 sps:$4 sm:$0xff]   ;;  %v3515_v25 = vld [vmem:[#allocation7 + $0x18] ss:$12 sps:$4 sm:$0xff]  }
  0xda   :  { %1387 = vmatprep.subr.bf16.mxu0 %v3436_v26  ;;  %1551 = vmatprep.subr.bf16.mxu1 %v3439_v27  ;;  %v3545_v26 = vld [vmem:[#allocation7 + $0x20] ss:$12 sps:$4 sm:$0xff]  }
  0xdb   :  { %v3520_v27 = vld [vmem:[#allocation7 + $0x34] ss:$12 sps:$4 sm:$0xff]  }
  0xdd   :  { %1388 = vmatpush1.bf16.msra.mxu0 %v3434_v28  ;;  %1552 = vmatpush1.bf16.msra.mxu1 %v3437_v29  ;;  %v3549_v28 = vld [vmem:[#allocation7 + $0xf8] ss:$12 sps:$4 sm:$0xff]   ;;  %v3518_v29 = vld [vmem:[#allocation7 + $0x30] ss:$12 sps:$4 sm:$0xff]  }
  0xde   :  { %1389 = vmatprep.subr.bf16.mxu0 %v3442_v30  ;;  %1553 = vmatprep.subr.bf16.mxu1 %v3445_v31  ;;  %v3550_v30 = vld [vmem:[#allocation7 + $0x38] ss:$12 sps:$4 sm:$0xff]  }
  0xdf   :  { %v3523_v31 = vld [vmem:[#allocation7 + $0x4c] ss:$12 sps:$4 sm:$0xff]  }
  0xe1   :  { %1390 = vmatpush1.bf16.msra.mxu0 %v3440_v32  ;;  %1554 = vmatpush1.bf16.msra.mxu1 %v3443_v33  ;;  %v3554_v32 = vld [vmem:[#allocation7 + $0x110] ss:$12 sps:$4 sm:$0xff]   ;;  %v3521_v33 = vld [vmem:[#allocation7 + $0x48] ss:$12 sps:$4 sm:$0xff]  }
  0xe2   :  { %1391 = vmatprep.subr.bf16.mxu0 %v3448_v34  ;;  %1555 = vmatprep.subr.bf16.mxu1 %v3451_v35  ;;  %v3555_v34 = vld [vmem:[#allocation7 + $0x50] ss:$12 sps:$4 sm:$0xff]  }
  0xe3   :  { %v3526_v35 = vld [vmem:[#allocation7 + $0x64] ss:$12 sps:$4 sm:$0xff]  }
  0xe5   :  { %1392 = vmatpush1.bf16.msra.mxu0 %v3446_v36  ;;  %1556 = vmatpush1.bf16.msra.mxu1 %v3449_v37  ;;  %v3559_v36 = vld [vmem:[#allocation7 + $0x128] ss:$12 sps:$4 sm:$0xff]   ;;  %v3524_v37 = vld [vmem:[#allocation7 + $0x60] ss:$12 sps:$4 sm:$0xff]  }
  0xe6   :  { %1393 = vmatprep.subr.bf16.mxu0 %v3454_v38  ;;  %1557 = vmatprep.subr.bf16.mxu1 %v3457_v39  ;;  %v3560_v38 = vld [vmem:[#allocation7 + $0x68] ss:$12 sps:$4 sm:$0xff]  }
  0xe7   :  { %v3529_v39 = vld [vmem:[#allocation7 + $0x7c] ss:$12 sps:$4 sm:$0xff]  }
  0xe9   :  { %1394 = vmatpush1.bf16.msra.mxu0 %v3452_v40  ;;  %1558 = vmatpush1.bf16.msra.mxu1 %v3455_v41  ;;  %v3564_v40 = vld [vmem:[#allocation7 + $0x140] ss:$12 sps:$4 sm:$0xff]   ;;  %v3527_v41 = vld [vmem:[#allocation7 + $0x78] ss:$12 sps:$4 sm:$0xff]  }
  0xea   :  { %1395 = vmatprep.subr.bf16.mxu0 %v3460_v42  ;;  %1559 = vmatprep.subr.bf16.mxu1 %v3463_v43  ;;  %v3565_v42 = vld [vmem:[#allocation7 + $0x80] ss:$12 sps:$4 sm:$0xff]  }
  0xeb   :  { %v3532_v43 = vld [vmem:[#allocation7 + $0x94] ss:$12 sps:$4 sm:$0xff]  }
  0xed   :  { %1396 = vmatpush1.bf16.msra.mxu0 %v3458_v44  ;;  %1560 = vmatpush1.bf16.msra.mxu1 %v3461_v45  ;;  %v3530_v44 = vld [vmem:[#allocation7 + $0x90] ss:$12 sps:$4 sm:$0xff]   ;;  %v3535_v45 = vld [vmem:[#allocation7 + $0xac] ss:$12 sps:$4 sm:$0xff]  }
  0xee   :  { %1397 = vmatprep.subr.bf16.mxu0 %v3466_v46  ;;  %1561 = vmatprep.subr.bf16.mxu1 %v3469_v47  ;;  %v3533_v46 = vld [vmem:[#allocation7 + $0xa8] ss:$12 sps:$4 sm:$0xff]   ;;  %v3538_v47 = vld [vmem:[#allocation7 + $0xc4] ss:$12 sps:$4 sm:$0xff]  }
  0xf1   :  { %1398 = vmatpush1.bf16.msra.mxu0 %v3464_v48  ;;  %1562 = vmatpush1.bf16.msra.mxu1 %v3467_v49  ;;  %v3536_v48 = vld [vmem:[#allocation7 + $0xc0] ss:$12 sps:$4 sm:$0xff]   ;;  %v3543_v49 = vld [vmem:[#allocation7 + $0xdc] ss:$12 sps:$4 sm:$0xff]  }
  0xf2   :  { %1399 = vmatprep.subr.bf16.mxu0 %v3472_v50  ;;  %1563 = vmatprep.subr.bf16.mxu1 %v3475_v51  ;;  %v3541_v50 = vld [vmem:[#allocation7 + $0xd8] ss:$12 sps:$4 sm:$0xff]   ;;  %v3548_v51 = vld [vmem:[#allocation7 + $0xf4] ss:$12 sps:$4 sm:$0xff]  }
  0xf5   :  { %1400 = vmatpush1.bf16.msra.mxu0 %v3470_v52  ;;  %1564 = vmatpush1.bf16.msra.mxu1 %v3473_v53  ;;  %v3546_v52 = vld [vmem:[#allocation7 + $0xf0] ss:$12 sps:$4 sm:$0xff]   ;;  %v3553_v53 = vld [vmem:[#allocation7 + $0x10c] ss:$12 sps:$4 sm:$0xff]  }
  0xf6   :  { %1401 = vmatprep.subr.bf16.mxu0 %v3478_v54  ;;  %1565 = vmatprep.subr.bf16.mxu1 %v3481_v55  ;;  %v3551_v54 = vld [vmem:[#allocation7 + $0x108] ss:$12 sps:$4 sm:$0xff]   ;;  %v3558_v55 = vld [vmem:[#allocation7 + $0x124] ss:$12 sps:$4 sm:$0xff]  }
  0xf9   :  { %1402 = vmatpush1.bf16.msra.mxu0 %v3476_v56  ;;  %1566 = vmatpush1.bf16.msra.mxu1 %v3479_v57  ;;  %v3556_v56 = vld [vmem:[#allocation7 + $0x120] ss:$12 sps:$4 sm:$0xff]   ;;  %v3563_v57 = vld [vmem:[#allocation7 + $0x13c] ss:$12 sps:$4 sm:$0xff]  }
  0xfa   :  { %1403 = vmatprep.subr.bf16.mxu0 %v3484_v58  ;;  %1567 = vmatprep.subr.bf16.mxu1 %v3487_v59  ;;  %v3561_v58 = vld [vmem:[#allocation7 + $0x138] ss:$12 sps:$4 sm:$0xff]   ;;  %v3568_v59 = vld [vmem:[#allocation7 + $0x154] ss:$12 sps:$4 sm:$0xff]  }
  0xfd   :  { %1404 = vmatpush1.bf16.msra.mxu0 %v3482_v60  ;;  %1568 = vmatpush1.bf16.msra.mxu1 %v3485_v61  ;;  %v3569_v60 = vld [vmem:[#allocation7 + $0x158] ss:$12 sps:$4 sm:$0xff]   ;;  %v3566_v61 = vld [vmem:[#allocation7 + $0x150] ss:$12 sps:$4 sm:$0xff]  }
  0xfe   :  { %1405 = vmatprep.subr.bf16.mxu0 %v3490_v62  ;;  %1569 = vmatprep.subr.bf16.mxu1 %v3493_v63  ;;  %v3570_v62 = vld [vmem:[#allocation7 + $0x98] ss:$12 sps:$4 sm:$0xff]  }
  0xff   :  { %v3573_v63 = vld [vmem:[#allocation7 + $0x16c] ss:$12 sps:$4 sm:$0xff]  }
 0x101   :  { %1406 = vmatpush1.bf16.msra.mxu0 %v3488_v0  ;;  %1570 = vmatpush1.bf16.msra.mxu1 %v3491_v1  ;;  %v3574_v0 = vld [vmem:[#allocation7 + $0x170] ss:$12 sps:$4 sm:$0xff]   ;;  %v3571_v1 = vld [vmem:[#allocation7 + $0x168] ss:$12 sps:$4 sm:$0xff]  }
 0x102   :  { %1407 = vmatprep.subr.bf16.mxu0 %v3496_v2  ;;  %1571 = vmatprep.subr.bf16.mxu1 %v3499_v3  ;;  %v3575_v2 = vld [vmem:[#allocation7 + $0xb0] ss:$12 sps:$4 sm:$0xff]  }
 0x103   :  { %v3578_v3 = vld [vmem:[#allocation7 + $0x184] ss:$12 sps:$4 sm:$0xff]  }
 0x105   :  { %1408 = vmatpush1.bf16.msra.mxu0 %v3494_v4  ;;  %1572 = vmatpush1.bf16.msra.mxu1 %v3497_v5  ;;  %v3579_v4 = vld [vmem:[#allocation7 + $0x248] ss:$12 sps:$4 sm:$0xff]   ;;  %v293_v5 = vlaneseq }
 0x106   :  { %1409 = vmatprep.subr.bf16.mxu0 %v3502_v6  ;;  %1573 = vmatprep.subr.bf16.mxu1 %v3505_v7 }
 0x107   :  { %v3884_v6 = vshrl.u32 %v293_v5, 7  ;;  %v3619_v5 = vld [vmem:[#allocation7 + $0x258] ss:$12 sps:$4 sm:$0xff]  }
 0x109   :  { %1410 = vmatpush1.bf16.msra.mxu0 %v3500_v8  ;;  %1574 = vmatpush1.bf16.msra.mxu1 %v3503_v9  ;;  %v295_v7 = vsub.s32 0, %v3884_v6  ;;  %v3890_v8 = vld [vmem:[%s3934_s2] sm:$0xf]  ;;  %v299_v9 = vsub.s32 1, %v3884_v6  ;;  %v307_v10 = vsub.s32 3, %v3884_v6 }
 0x10a   :  { %1420 = vmatprep.subr.bf16.mxu0 %v3508_v11  ;;  %1584 = vmatprep.subr.bf16.mxu1 %v3511_v12 }
 0x10b   :  { %v296_v11 = vrot.slane %v3890_v8, %v295_v7  ;;  %v300_v12 = vrot.slane %v3890_v8, %v299_v9 }
 0x10c   :  { %1412 = vmatmul.mubr.bf16.vlgmr.msra.gmra.mrb[0].mxu0 %v92_v15  ;;  %1576 = vmatmul.mubr.bf16.vlgmr.msra.gmra.mrb[0].mxu1 %v92_v15 }
 0x10d   :  { %1421 = vmatpush1.bf16.msra.mxu0 %v3506_v13  ;;  %1585 = vmatpush1.bf16.msra.mxu1 %v3509_v14  ;;  %v308_v13 = vrot.slane %v3890_v8, %v307_v10  ;;  %v3622_v10 = vld [vmem:[#allocation7 + $0x270] ss:$12 sps:$4 sm:$0xff]  }
 0x10e   :  { %1452 = vmatprep.mubr.bf16.mxu0 %v3792_v18  ;;  %1616 = vmatprep.mubr.bf16.mxu1 %v3792_v18 }
 0x10f   :  { %2290 = vmatprep.subr.bf16.mxu0 %v3514_v16  ;;  %3075 = vmatprep.subr.bf16.mxu1 %v3539_v17 }
 0x118   :  { %2952 = vmatmul.mubr.msk.bf16.vlgmr.msra.gmra.mrb[0].mxu0 %vm1293_vm0, %v94_v22  ;;  %2953 = vmatmul.mubr.msk.bf16.vlgmr.msra.gmra.mrb[0].mxu1 %vm1293_vm0, %v94_v22 }
 0x119   :  { %2291 = vmatpush1.bf16.msra.mxu0 %v3512_v20  ;;  %3076 = vmatpush3.bf16.msra.mxu1 %v3540_v21 }
 0x11a   :  { %2292 = vmatprep.subr.bf16.mxu0 %v3517_v23  ;;  %3077 = vmatprep.subr.bf16.mxu1 %v3544_v24 }
 0x11d   :  { %2293 = vmatpush1.bf16.msra.mxu0 %v3515_v25  ;;  %3078 = vmatpush3.bf16.msra.mxu1 %v3545_v26 }
 0x11e   :  { %2294 = vmatprep.subr.bf16.mxu0 %v3520_v27  ;;  %3079 = vmatprep.subr.bf16.mxu1 %v3549_v28 }
 0x121   :  { %2295 = vmatpush1.bf16.msra.mxu0 %v3518_v29  ;;  %3080 = vmatpush3.bf16.msra.mxu1 %v3550_v30  ;;  %v3576_v29 = vld [vmem:[#allocation7 + $0x180] ss:$12 sps:$4 sm:$0xff]   ;;  %v3580_v30 = vld [vmem:[#allocation7 + $0x188] ss:$12 sps:$4 sm:$0xff]  }
 0x122   :  { %2296 = vmatprep.subr.bf16.mxu0 %v3523_v31  ;;  %3081 = vmatprep.subr.bf16.mxu1 %v3554_v32  ;;  %v3583_v32 = vld [vmem:[#allocation7 + $0x19c] ss:$12 sps:$4 sm:$0xff]  }
 0x125   :  { %2297 = vmatpush1.bf16.msra.mxu0 %v3521_v33  ;;  %3082 = vmatpush3.bf16.msra.mxu1 %v3555_v34  ;;  %v3584_v33 = vld [vmem:[#allocation7 + $0x260] ss:$12 sps:$4 sm:$0xff]  }
 0x126   :  { %2298 = vmatprep.subr.bf16.mxu0 %v3526_v35  ;;  %3083 = vmatprep.subr.bf16.mxu1 %v3559_v36  ;;  %v3581_v35 = vld [vmem:[#allocation7 + $0x198] ss:$12 sps:$4 sm:$0xff]   ;;  %v3585_v36 = vld [vmem:[#allocation7 + $0x1a0] ss:$12 sps:$4 sm:$0xff]  }
 0x129   :  { %2299 = vmatpush1.bf16.msra.mxu0 %v3524_v37  ;;  %3084 = vmatpush3.bf16.msra.mxu1 %v3560_v38  ;;  %v3588_v37 = vld [vmem:[#allocation7 + $0x1b4] ss:$12 sps:$4 sm:$0xff]   ;;  %v3589_v38 = vld [vmem:[#allocation7 + $0x278] ss:$12 sps:$4 sm:$0xff]  }
 0x12a   :  { %2300 = vmatprep.subr.bf16.mxu0 %v3529_v39  ;;  %3085 = vmatprep.subr.bf16.mxu1 %v3564_v40  ;;  %v3586_v39 = vld [vmem:[#allocation7 + $0x1b0] ss:$12 sps:$4 sm:$0xff]   ;;  %v3590_v40 = vld [vmem:[#allocation7 + $0x1b8] ss:$12 sps:$4 sm:$0xff]  }
 0x12d   :  { %2301 = vmatpush1.bf16.msra.mxu0 %v3527_v41  ;;  %3086 = vmatpush3.bf16.msra.mxu1 %v3565_v42  ;;  %v3593_v41 = vld [vmem:[#allocation7 + $0x1cc] ss:$12 sps:$4 sm:$0xff]   ;;  %v3594_v42 = vld [vmem:[#allocation7 + $0x290] ss:$12 sps:$4 sm:$0xff]  }
 0x12e   :  { %2302 = vmatprep.subr.bf16.mxu0 %v3532_v43  ;;  %3087 = vmatprep.subr.bf16.mxu1 %v3569_v60  ;;  %v3591_v43 = vld [vmem:[#allocation7 + $0x1c8] ss:$12 sps:$4 sm:$0xff]   ;;  %v3613_v60 = vld [vmem:[#allocation7 + $0x22c] ss:$12 sps:$4 sm:$0xff]  }
 0x131   :  { %2303 = vmatpush1.bf16.msra.mxu0 %v3530_v44  ;;  %3088 = vmatpush3.bf16.msra.mxu1 %v3570_v62  ;;  %v3595_v44 = vld [vmem:[#allocation7 + $0x1d0] ss:$12 sps:$4 sm:$0xff]   ;;  %v3611_v62 = vld [vmem:[#allocation7 + $0x228] ss:$12 sps:$4 sm:$0xff]  }
 0x132   :  { %2304 = vmatprep.subr.bf16.mxu0 %v3535_v45  ;;  %3089 = vmatprep.subr.bf16.mxu1 %v3574_v0  ;;  %v3598_v45 = vld [vmem:[#allocation7 + $0x1e4] ss:$12 sps:$4 sm:$0xff]  }
 0x135   :  { %2305 = vmatpush1.bf16.msra.mxu0 %v3533_v46  ;;  %3090 = vmatpush3.bf16.msra.mxu1 %v3575_v2  ;;  %v3599_v46 = vld [vmem:[#allocation7 + $0x2a8] ss:$12 sps:$4 sm:$0xff]   ;;  %v3616_v2 = vld [vmem:[#allocation7 + $0x240] ss:$12 sps:$4 sm:$0xff]  }
 0x136   :  { %2306 = vmatprep.subr.bf16.mxu0 %v3538_v47  ;;  %3097 = vmatprep.subr.bf16.mxu1 %v3579_v4  ;;  %v3596_v47 = vld [vmem:[#allocation7 + $0x1e0] ss:$12 sps:$4 sm:$0xff]   ;;  %v3621_v4 = vld [vmem:[#allocation7 + $0x25c] ss:$12 sps:$4 sm:$0xff]  }
 0x139   :  { %2307 = vmatpush1.bf16.msra.mxu0 %v3536_v48  ;;  %v3600_v48 = vld [vmem:[#allocation7 + $0x1e8] ss:$12 sps:$4 sm:$0xff]  }
 0x13a   :  { %2308 = vmatprep.subr.bf16.mxu0 %v3543_v49  ;;  %v303_v49 = vsub.s32 2, %v3884_v6  ;;  %v3658_v6 = vld [vmem:[#allocation8 + $0x90] sm:$0xff]  }
 0x13d   :  { %2309 = vmatpush1.bf16.msra.mxu0 %v3541_v50  ;;  %v3603_v50 = vld [vmem:[#allocation7 + $0x1fc] ss:$12 sps:$4 sm:$0xff]  }
 0x13e   :  { %2310 = vmatprep.subr.bf16.mxu0 %v3548_v51  ;;  %v3604_v51 = vld [vmem:[#allocation7 + $0x2c0] ss:$12 sps:$4 sm:$0xff]  }
 0x141   :  { %2311 = vmatpush1.bf16.msra.mxu0 %v3546_v52  ;;  %v3601_v52 = vld [vmem:[#allocation7 + $0x1f8] ss:$12 sps:$4 sm:$0xff]  }
 0x142   :  { %2312 = vmatprep.subr.bf16.mxu0 %v3553_v53  ;;  %v3605_v53 = vld [vmem:[#allocation7 + $0x200] ss:$12 sps:$4 sm:$0xff]  }
 0x145   :  { %2313 = vmatpush1.bf16.msra.mxu0 %v3551_v54  ;;  %v304_v54 = vrot.slane %v3890_v8, %v303_v49  ;;  %v3624_v8 = vld [vmem:[#allocation7 + $0x274] ss:$12 sps:$4 sm:$0xff]  }
 0x146   :  { %2314 = vmatprep.subr.bf16.mxu0 %v3558_v55  ;;  %v3608_v55 = vld [vmem:[#allocation7 + $0x214] ss:$12 sps:$4 sm:$0xff]  }
 0x149   :  { %2315 = vmatpush1.bf16.msra.mxu0 %v3556_v56  ;;  %v3609_v56 = vld [vmem:[#allocation7 + $0x2d8] ss:$12 sps:$4 sm:$0xff]  }
 0x14a   :  { %2316 = vmatprep.subr.bf16.mxu0 %v3563_v57  ;;  %v3606_v57 = vld [vmem:[#allocation7 + $0x210] ss:$12 sps:$4 sm:$0xff]  }
 0x14d   :  { %2317 = vmatpush1.bf16.msra.mxu0 %v3561_v58  ;;  %v3610_v58 = vld [vmem:[#allocation7 + $0x218] ss:$12 sps:$4 sm:$0xff]  }
 0x14e   :  { %2318 = vmatprep.subr.bf16.mxu0 %v3568_v59 }
 0x151   :  { %2319 = vmatpush1.bf16.msra.mxu0 %v3566_v61  ;;  %v3614_v61 = vld [vmem:[#allocation7 + $0x2f0] ss:$12 sps:$4 sm:$0xff]  }
 0x152   :  { %2320 = vmatprep.subr.bf16.mxu0 %v3573_v63  ;;  %v3615_v63 = vld [vmem:[#allocation7 + $0x230] ss:$12 sps:$4 sm:$0xff]  }
 0x155   :  { %2321 = vmatpush1.bf16.msra.mxu0 %v3571_v1  ;;  %v3618_v1 = vld [vmem:[#allocation7 + $0x244] ss:$12 sps:$4 sm:$0xff]  }
 0x156   :  { %2331 = vmatprep.subr.bf16.mxu0 %v3578_v3 }
 0x1eb   :  { %v1454_v14 = vpop.f32.mrb[0].mxu0  ;;  %v3901_v15 = vpop.f32.mrb[0].mxu1 }
 0x1ec   :  { %v3170_v16 = vadd.f32 %v1454_v14, %v296_v11  ;;  %v1456_v17 = vpop.f32.mrb[1].mxu0  ;;  %v1620_v18 = vpop.f32.mrb[1].mxu1  ;;  %v3172_v59 = vadd.f32 %v3901_v15, %v304_v54  ;;  %v3627_v11 = vld [vmem:[#allocation7 + $0x28c] ss:$12 sps:$4 sm:$0xff]   ;;  %v3633_v15 = vld [vmem:[#allocation7 + $0x2bc] ss:$12 sps:$4 sm:$0xff]  }
 0x1ed   :  { %v3171_v19 = vadd.f32 %v1456_v17, %v300_v12  ;;  %v3173_v20 = vadd.f32 %v1620_v18, %v308_v13  ;;  %v1458_v21 = vpop.f32.mrb[2].mxu0  ;;  %v1622_v22 = vpop.f32.mrb[2].mxu1  ;;  %v3625_v12 = vld [vmem:[#allocation7 + $0x288] ss:$12 sps:$4 sm:$0xff]   ;;  %v3630_v13 = vld [vmem:[#allocation7 + $0x2a4] ss:$12 sps:$4 sm:$0xff]  }
 0x1ee   :  { %v1625_v23 = vmax.f32 %v3170_v16, 0.0  ;;  %v1459_v24 = vpop.f32.mrb[3].mxu0  ;;  %v1623_v25 = vpop.f32.mrb[3].mxu1  ;;  %v1627_v0 = vmax.f32 %v3172_v59, 0.0  ;;  %v3628_v14 = vld [vmem:[#allocation7 + $0x2a0] ss:$12 sps:$4 sm:$0xff]  }
 0x1ef   :  { %v1626_v26 = vmax.f32 %v3171_v19, 0.0  ;;  %v1628_v27 = vmax.f32 %v3173_v20, 0.0  ;;  %v3631_v16 = vld [vmem:[#allocation7 + $0x2b8] ss:$12 sps:$4 sm:$0xff]   ;;  %v3636_v17 = vld [vmem:[#allocation7 + $0x2d4] ss:$12 sps:$4 sm:$0xff]  }
 0x1f0   :  { %v1629_v31 = vpack.c.bf16 %v1625_v23, %v1625_v23  ;;  %v1631_v3 = vpack.c.bf16 %v1627_v0, %v1627_v0  ;;  %v3634_v18 = vld [vmem:[#allocation7 + $0x2d0] ss:$12 sps:$4 sm:$0xff]   ;;  %v3639_v19 = vld [vmem:[#allocation7 + $0x2ec] ss:$12 sps:$4 sm:$0xff]   ;;  %v3637_v20 = vld [vmem:[#allocation7 + $0x2e8] ss:$12 sps:$4 sm:$0xff]  }
 0x1f1   :  { %v1630_v28 = vpack.c.bf16 %v1626_v26, %v1626_v26  ;;  %v1632_v34 = vpack.c.bf16 %v1628_v27, %v1628_v27  ;;  %v3640_v21 = vld [vmem:[#allocation8 + $0x40] sm:$0xff]   ;;  %v3642_v23 = vld [vmem:[#allocation8 + $0x48] sm:$0xff]   ;;  %v3644_v25 = vld [vmem:[#allocation8 + $0x50] sm:$0xff]  }
 0x1f2   :  { %v3641_v22 = vld [vmem:[#allocation8] sm:$0xff]   ;;  %v3643_v24 = vld [vmem:[#allocation8 + $0x8] sm:$0xff]   ;;  %v3645_v26 = vld [vmem:[#allocation8 + $0x10] sm:$0xff]  }
 0x1f3   :  { %2322 = vmatprep.mubr.bf16.mxu0 %v1630_v28  ;;  %2404 = vmatprep.mubr.bf16.mxu1 %v1630_v28  ;;  %v3646_v27 = vld [vmem:[#allocation8 + $0x58] sm:$0xff]  }
 0x1f4   :  { %2323 = vmatmul.mubr.bf16.vlgmr.msra.gmra.mrb[4].mxu0 %v1629_v31  ;;  %2405 = vmatmul.mubr.bf16.vlgmr.msra.gmra.mrb[4].mxu1 %v1629_v31  ;;  %v3647_v28 = vld [vmem:[#allocation8 + $0x18] sm:$0xff]   ;;  %v3650_v31 = vld [vmem:[#allocation8 + $0x68] sm:$0xff]  }
 0x1f5   :  { %2332 = vmatpush1.bf16.msra.mxu0 %v3576_v29  ;;  %3098 = vmatpush3.bf16.msra.mxu1 %v3580_v30  ;;  %v3648_v29 = vld [vmem:[#allocation8 + $0x60] sm:$0xff]  }
 0x1f6   :  { %2363 = vmatprep.mubr.bf16.mxu0 %v1632_v34  ;;  %2444 = vmatprep.mubr.bf16.mxu1 %v1632_v34  ;;  %v3649_v30 = vld [vmem:[#allocation8 + $0x20] sm:$0xff]   ;;  %v3653_v34 = vld [vmem:[#allocation8 + $0x30] sm:$0xff]  }
 0x1f7   :  { %2333 = vmatprep.subr.bf16.mxu0 %v3583_v32  ;;  %3099 = vmatprep.subr.bf16.mxu1 %v3584_v33  ;;  %v3651_v32 = vld [vmem:[#allocation8 + $0x28] sm:$0xff]   ;;  %v3652_v33 = vld [vmem:[#allocation8 + $0x70] sm:$0xff]  }
 0x1f9   :  { %2334 = vmatpush1.bf16.msra.mxu0 %v3581_v35  ;;  %3100 = vmatpush3.bf16.msra.mxu1 %v3585_v36  ;;  %v3654_v35 = vld [vmem:[#allocation8 + $0x78] sm:$0xff]  }
 0x1fa   :  { %2335 = vmatprep.subr.bf16.mxu0 %v3588_v37  ;;  %3101 = vmatprep.subr.bf16.mxu1 %v3589_v38  ;;  %v3655_v36 = vld [vmem:[#allocation8 + $0x38] sm:$0xff]   ;;  %v3793_v37 = vmov 0.0  }
 0x1fd   :  { %2336 = vmatpush1.bf16.msra.mxu0 %v3586_v39  ;;  %3102 = vmatpush3.bf16.msra.mxu1 %v3590_v40 }
 0x1fe   :  { %2337 = vmatprep.subr.bf16.mxu0 %v3593_v41  ;;  %3103 = vmatprep.subr.bf16.mxu1 %v3594_v42 }
 0x201   :  { %2338 = vmatpush1.bf16.msra.mxu0 %v3591_v43  ;;  %3104 = vmatpush3.bf16.msra.mxu1 %v3595_v44  ;;  %v1761_v43 = vld [vmem:[%s3936_s4] sm:$0x7] }
 0x202   :  { %2339 = vmatprep.subr.bf16.mxu0 %v3598_v45  ;;  %3105 = vmatprep.subr.bf16.mxu1 %v3599_v46  ;;  %v1774_v44 = vrot.slane %v1761_v43, %v303_v49  ;;  %v1770_v54 = vrot.slane %v1761_v43, %v299_v9  ;;  %v3660_v9 = vld [vmem:[#allocation8 + $0xa0] sm:$0xff]  }
 0x205   :  { %2340 = vmatpush1.bf16.msra.mxu0 %v3596_v47  ;;  %3106 = vmatpush3.bf16.msra.mxu1 %v3600_v48 }
 0x206   :  { %2341 = vmatprep.subr.bf16.mxu0 %v3603_v50  ;;  %3107 = vmatprep.subr.bf16.mxu1 %v3604_v51 }
 0x209   :  { %2342 = vmatpush1.bf16.msra.mxu0 %v3601_v52  ;;  %3108 = vmatpush3.bf16.msra.mxu1 %v3605_v53  ;;  %v1766_v53 = vrot.slane %v1761_v43, %v295_v7  ;;  %v3659_v7 = vld [vmem:[#allocation8 + $0x98] sm:$0xff]  }
 0x20a   :  { %2343 = vmatprep.subr.bf16.mxu0 %v3608_v55  ;;  %3109 = vmatprep.subr.bf16.mxu1 %v3609_v56 }
 0x20d   :  { %2344 = vmatpush1.bf16.msra.mxu0 %v3606_v57  ;;  %3110 = vmatpush3.bf16.msra.mxu1 %v3610_v58 }
 0x20e   :  { %2345 = vmatprep.subr.bf16.mxu0 %v3613_v60  ;;  %3111 = vmatprep.subr.bf16.mxu1 %v3614_v61 }
 0x211   :  { %2346 = vmatpush1.bf16.msra.mxu0 %v3611_v62  ;;  %3112 = vmatpush3.bf16.msra.mxu1 %v3615_v63  ;;  %v3656_v63 = vld [vmem:[#allocation8 + $0x80] sm:$0xff]  }
 0x212   :  { %2347 = vmatprep.subr.bf16.mxu0 %v3618_v1  ;;  %3119 = vmatprep.subr.bf16.mxu1 %v3640_v21  ;;  %v3657_v1 = vld [vmem:[#allocation8 + $0x88] sm:$0xff]  }
 0x214   :  { %2445 = vmatmul.mubr.bf16.vlgmr.msra.gmra.mrb[8].mxu1 %v1631_v3 }
 0x215   :  { %2348 = vmatpush1.bf16.msra.mxu0 %v3616_v2  ;;  %3120 = vmatpush3.bf16.msra.mxu1 %v3641_v22  ;;  %v3661_v2 = vld [vmem:[#allocation8 + $0xa8] sm:$0xff]  }
 0x216   :  { %2349 = vmatprep.subr.bf16.mxu0 %v3621_v4  ;;  %3121 = vmatprep.subr.bf16.mxu1 %v3642_v23  ;;  %v3663_v4 = vld [vmem:[#allocation8 + $0xb8] sm:$0xff]  }
 0x219   :  { %2350 = vmatpush1.bf16.msra.mxu0 %v3619_v5  ;;  %3122 = vmatpush3.bf16.msra.mxu1 %v3643_v24 }
 0x21a   :  { %2351 = vmatprep.subr.bf16.mxu0 %v3624_v8  ;;  %3123 = vmatprep.subr.bf16.mxu1 %v3644_v25 }
 0x21d   :  { %2352 = vmatpush1.bf16.msra.mxu0 %v3622_v10  ;;  %3124 = vmatpush3.bf16.msra.mxu1 %v3645_v26 }
 0x21e   :  { %2353 = vmatprep.subr.bf16.mxu0 %v3627_v11  ;;  %3125 = vmatprep.subr.bf16.mxu1 %v3646_v27 }
 0x221   :  { %2354 = vmatpush1.bf16.msra.mxu0 %v3625_v12  ;;  %3126 = vmatpush3.bf16.msra.mxu1 %v3647_v28 }
 0x222   :  { %2355 = vmatprep.subr.bf16.mxu0 %v3630_v13  ;;  %3127 = vmatprep.subr.bf16.mxu1 %v3648_v29 }
 0x225   :  { %2356 = vmatpush1.bf16.msra.mxu0 %v3628_v14  ;;  %3128 = vmatpush3.bf16.msra.mxu1 %v3649_v30 }
 0x226   :  { %2357 = vmatprep.subr.bf16.mxu0 %v3633_v15  ;;  %3129 = vmatprep.subr.bf16.mxu1 %v3650_v31  ;;  %v3050_v15 = vld [vmem:[%s3938_s6] ss:$0 sm:$0xff] }
 0x229   :  { %2358 = vmatpush1.bf16.msra.mxu0 %v3631_v16  ;;  %3130 = vmatpush3.bf16.msra.mxu1 %v3651_v32 }
 0x22a   :  { %2359 = vmatprep.subr.bf16.mxu0 %v3636_v17  ;;  %3131 = vmatprep.subr.bf16.mxu1 %v3652_v33 }
 0x22d   :  { %2360 = vmatpush1.bf16.msra.mxu0 %v3634_v18  ;;  %3132 = vmatpush3.bf16.msra.mxu1 %v3653_v34 }
 0x22e   :  { %2361 = vmatprep.subr.bf16.mxu0 %v3639_v19  ;;  %3133 = vmatprep.subr.bf16.mxu1 %v3654_v35 }
 0x231   :  { %2362 = vmatpush1.bf16.msra.mxu0 %v3637_v20  ;;  %3134 = vmatpush3.bf16.msra.mxu1 %v3655_v36 }
 0x232   :  { %3150 = vmatprep.subr.bf16.mxu1 %v3793_v37 }
 0x234   :  { %2364 = vmatmul.mubr.bf16.vlgmr.msra.gmra.mrb[4].mxu0 %v1631_v3  ;;  %v3662_v3 = vld [vmem:[#allocation8 + $0xb0] sm:$0xff]  }
 0x2c7   :  { %v3091_v38 = vpop.f32.mrb[4].mxu1 }
 0x2c8   :  { %v3092_v39 = vpop.f32.mrb[5].mxu1 }
 0x2c9   :  { %v3093_v40 = vadd.f32 %v3092_v39, %v3091_v38  ;;  %v3094_v41 = vpop.f32.mrb[6].mxu1 }
 0x2ca   :  { %v3095_v42 = vpop.f32.mrb[7].mxu1 }
 0x2cb   :  { %v2407_v47 = vadd.f32 %v3093_v40, %v1774_v44 }
 0x2e7   :  { %v3113_v45 = vpop.f32.mrb[8].mxu1 }
 0x2e8   :  { %v3114_v46 = vpop.f32.mrb[9].mxu1 }
 0x2e9   :  { %v3115_v48 = vadd.f32 %v3114_v46, %v3113_v45  ;;  %v3116_v50 = vpop.f32.mrb[10].mxu1 }
 0x2ea   :  { %v3117_v51 = vpop.f32.mrb[11].mxu1 }
 0x2eb   :  { %v2447_v52 = vadd.f32 %v3115_v48, %v2407_v47 }
 0x2ed   :  { %v2454_v5 = vmax.f32 %v2447_v52, 0.0 }
 0x2ef   :  { %v2457_v8 = vpack.c.bf16 %v2454_v5, %v2454_v5 }
 0x307   :  { %v2365_v55 = vpop.f32.mrb[4].mxu0 }
 0x308   :  { %v3174_v56 = vadd.f32 %v2365_v55, %v1766_v53  ;;  %v2367_v57 = vpop.f32.mrb[5].mxu0 }
 0x309   :  { %v3175_v58 = vadd.f32 %v2367_v57, %v1770_v54  ;;  %v2369_v59 = vpop.f32.mrb[6].mxu0 }
 0x30a   :  { %v2452_v60 = vmax.f32 %v3174_v56, 0.0  ;;  %v2370_v49 = vpop.f32.mrb[7].mxu0 }
 0x30b   :  { %v2453_v61 = vmax.f32 %v3175_v58, 0.0 }
 0x30c   :  { %v2455_v0 = vpack.c.bf16 %v2452_v60, %v2452_v60 }
 0x30d   :  { %v2456_v62 = vpack.c.bf16 %v2453_v61, %v2453_v61 }
 0x30f   :  { %2689 = vmatprep.mubr.bf16.mxu1 %v2456_v62 }
 0x310   :  { %2690 = vmatmul.mubr.bf16.vlgmr.msra.gmra.mrb[12].mxu1 %v2455_v0 }
 0x311   :  { %3151 = vmatpush3.bf16.msra.mxu1 %v3656_v63  ;;  %3166 = vmatprep.mubr.msk.bf16.mxu1 %vm3794_vm1, %v3793_v37 }
 0x312   :  { %3152 = vmatprep.subr.bf16.mxu1 %v3793_v37 }
 0x315   :  { %3153 = vmatpush3.bf16.msra.mxu1 %v3657_v1 }
 0x316   :  { %3154 = vmatprep.subr.bf16.mxu1 %v3793_v37 }
 0x319   :  { %3155 = vmatpush3.bf16.msra.mxu1 %v3658_v6 }
 0x31a   :  { %3156 = vmatprep.subr.bf16.mxu1 %v3793_v37 }
 0x31d   :  { %3157 = vmatpush3.bf16.msra.mxu1 %v3659_v7 }
 0x31e   :  { %3158 = vmatprep.subr.bf16.mxu1 %v3793_v37 }
 0x321   :  { %3159 = vmatpush3.bf16.msra.mxu1 %v3660_v9 }
 0x322   :  { %3160 = vmatprep.subr.bf16.mxu1 %v3793_v37 }
 0x325   :  { %3161 = vmatpush3.bf16.msra.mxu1 %v3661_v2 }
 0x326   :  { %3162 = vmatprep.subr.bf16.mxu1 %v3793_v37 }
 0x329   :  { %3163 = vmatpush3.bf16.msra.mxu1 %v3662_v3 }
 0x32a   :  { %3164 = vmatprep.subr.bf16.mxu1 %v3793_v37 }
 0x32d   :  { %3165 = vmatpush3.bf16.msra.mxu1 %v3663_v4 }
 0x330   :  { %3167 = vmatmul.mubr.bf16.vlgmr.msra.gmra.mrb[16].mxu1 %v2457_v8 }
 0x3e3   :  { %v3135_v10 = vpop.f32.mrb[12].mxu1 }
 0x3e4   :  { %v3136_v11 = vpop.f32.mrb[13].mxu1 }
 0x3e5   :  { %v3137_v12 = vadd.f32 %v3136_v11, %v3135_v10  ;;  %v3138_v13 = vpop.f32.mrb[14].mxu1 }
 0x3e6   :  { %v3139_v14 = vpop.f32.mrb[15].mxu1 }
 0x3e7   :  { %v2692_v16 = vadd.f32 %v3137_v12, %v3050_v15 }
 0x403   :  { %v2731_v17 = vpop.f32.mrb[16].mxu1 }
 0x404   :  { %v2732_v18 = vadd.f32 %v2731_v17, %v2692_v16  ;;  %v3168_v19 = vpop.f32.mrb[17].mxu1 }
 0x405   :  { %v2734_v20 = vpop.f32.mrb[18].mxu1 }
 0x406   :  { %v2737_v21 = vpack.c.bf16 %v2732_v18, %v2732_v18  ;;  %v3169_v22 = vpop.f32.mrb[19].mxu1 }
 0x408   :  { %2738 = vst [vmem:[#allocation10] sm:$0xf] %v2737_v21 }
 0x409   :  { %3763 = shalt.err (!%p3760_p8)
}
 0x40a   :  { %s3764_s12 = scalar_lea.hbm %s3939_s7, 64 }
 0x40b   :  { %p3765_p9 = scmp.ne.s32.totalorder %s3939_s7, %s3764_s12  ;;  %p3768_p10 = scmp.lt.u32.totalorder %s3764_s12, %s3939_s7 }
 0x40d   :  { %p3770_p11 = pnand %p3768_p10, %p3765_p9 }
 0x40f   :  { %3773 = shalt.err (!%p3770_p11)
}
 0x410   :  { %2748 = dma.vmem_to_hbm [thread:$0]  %s2746_s9, 64, %s3939_s7, [#allocation4]  }
 0x411   :  { %3780 = dma.done.wait [#allocation4], 64  }
 0x412   :  { %3781 = vsyncadd [#allocation4], 4294967232 }
 0x413   :  { %2752 = vsyncpa [#allocation3], 1 }
 0x414   :  { %2753 = vsyncpa [#allocation6], 1 }
 0x415   :  { %2754 = vsyncpa [#allocation9], 1 }
 0x416   :  { %2755 = vsyncpa [#allocation4], 1 }

</bundles_post_ra>
